<compile_context>
chip_gen: v5e
topology: v5e:2x2
jax: 0.10.0
libtpu: 0.0.40
codegen_flags: <defaults>
</compile_context>

<pallas_src>
import jax
import jax.numpy as jnp
from jax.experimental import pallas as pl
from jax.experimental.pallas import tpu as pltpu


def _round_up(v, m):
    return ((v + m - 1) // m) * m


def vae_kernel(x_ref, eps_ref,
               w1_ref, b1_ref, w2_ref, b2_ref,
               w31_ref, b31_ref, w32_ref, b32_ref,
               w4_ref, b4_ref, w5_ref, b5_ref, w6_ref, b6_ref,
               recon_ref, mu_ref, logvar_ref):
    """Full VAE forward (encoder + reparameterization + decoder) for one batch tile."""
    bf16 = jnp.bfloat16
    f32 = jnp.float32

    # x arrives unpadded f32; cast to bf16 in VMEM (x is read from HBM exactly once).
    x = x_ref[...].astype(bf16)                                              # [TB, 784]

    # ---- encoder ----
    h = jnp.dot(x, w1_ref[...], preferred_element_type=f32) + b1_ref[...]
    h = jnp.maximum(h, 0.0)
    h = jnp.dot(h.astype(bf16), w2_ref[...], preferred_element_type=f32) + b2_ref[...]
    h = jnp.maximum(h, 0.0)
    hb = h.astype(bf16)
    mu = jnp.dot(hb, w31_ref[...], preferred_element_type=f32) + b31_ref[...]
    log_var = jnp.dot(hb, w32_ref[...], preferred_element_type=f32) + b32_ref[...]

    # ---- sampling (reparameterization), kept in f32 ----
    std = jnp.exp(0.5 * log_var)
    z = eps_ref[...] * std + mu

    # ---- decoder ----
    d = jnp.dot(z.astype(bf16), w4_ref[...], preferred_element_type=f32) + b4_ref[...]
    d = jnp.maximum(d, 0.0)
    d = jnp.dot(d.astype(bf16), w5_ref[...], preferred_element_type=f32) + b5_ref[...]
    d = jnp.maximum(d, 0.0)
    logits = jnp.dot(d.astype(bf16), w6_ref[...], preferred_element_type=f32) + b6_ref[...]

    # sigmoid(x) == 0.5 * tanh(0.5 * x) + 0.5 : a single EUP op on the widest stage.
    recon_ref[...] = (0.5 * jnp.tanh(0.5 * logits) + 0.5).astype(recon_ref.dtype)
    mu_ref[...] = mu
    logvar_ref[...] = log_var


def prepare_params(params):
    """One-time packing: weights -> bf16 [in, out], biases -> f32 [1, out].

    Call once outside the training/inference step so no dtype churn or extra
    HBM pass over the weights happens on the per-call forward path.
    """
    (w1, b1, w2, b2, w31, b31, w32, b32, w4, b4, w5, b5, w6, b6) = params

    def pack_w(w):
        return jnp.asarray(w, jnp.bfloat16)

    def pack_b(b):
        return jnp.asarray(b, jnp.float32).reshape(1, -1)

    ws = (w1, w2, w31, w32, w4, w5, w6)
    bs = (b1, b2, b31, b32, b4, b5, b6)
    packed = []
    for w, b in zip(ws, bs):
        packed.append(pack_w(w))
        packed.append(pack_b(b))
    return tuple(packed)


def _choose_batch_tile(B):
    """Batch tile size: big enough to amortize per-grid-step overhead, and for
    large B split into >= 2 steps so v7x's two TensorCores both get work."""
    if B <= 256:
        return _round_up(max(B, 16), 16)          # single step; multiple of 16
    return min(1024, _round_up(pl.cdiv(B, 2), 128))


def vae_forward(x_nchw, eps, packed_params, *, trim_outputs=True):
    """x_nchw: [B,1,28,28] f32; eps: [B, z_dim] f32; packed_params from prepare_params.

    Returns (recon [B, x_dim] bf16, mu [B, z_dim] f32, log_var [B, z_dim] f32).
    With trim_outputs=False the padded [B_pad, ...] buffers are returned so a
    downstream (masked) loss can consume them without an extra slice copy.
    """
    (w1, b1, w2, b2, w31, b31, w32, b32, w4, b4, w5, b5, w6, b6) = packed_params

    B = x_nchw.shape[0]
    x_flat = x_nchw.reshape(B, -1).astype(jnp.float32)     # x.view(-1, 784)
    x_dim = x_flat.shape[1]
    z_dim = eps.shape[1]
    h1, h2, hv = w1.shape[1], w2.shape[1], w5.shape[1]

    TB = _choose_batch_tile(B)
    B_pad = _round_up(B, TB)
    grid = (B_pad // TB,)

    eps = eps.astype(jnp.float32)
    if B_pad != B:  # row-only pad (no dtype churn); no-op whenever B % TB == 0
        x_flat = jnp.pad(x_flat, ((0, B_pad - B), (0, 0)))
        eps = jnp.pad(eps, ((0, B_pad - B), (0, 0)))

    def row_map(i):
        return (i, 0)

    def const_map(i):          # weights/biases stay VMEM-resident across grid steps
        return (0, 0)

    def batch_spec(cols):
        return pl.BlockSpec((TB, cols), row_map)

    def const_spec(shape):
        return pl.BlockSpec(shape, const_map)

    in_specs = [
        batch_spec(x_dim),                                   # x    f32 [TB, 784]
        batch_spec(z_dim),                                   # eps  f32 [TB, 32]
        const_spec((x_dim, h1)), const_spec((1, h1)),        # fc1
        const_spec((h1, h2)),    const_spec((1, h2)),        # fc2
        const_spec((h2, z_dim)), const_spec((1, z_dim)),     # fc31 (mu)
        const_spec((h2, z_dim)), const_spec((1, z_dim)),     # fc32 (log_var)
        const_spec((z_dim, h2)), const_spec((1, h2)),        # fc4
        const_spec((h2, hv)),    const_spec((1, hv)),        # fc5
        const_spec((hv, x_dim)), const_spec((1, x_dim)),     # fc6
    ]
    out_specs = (batch_spec(x_dim), batch_spec(z_dim), batch_spec(z_dim))
    out_shapes = (
        jax.ShapeDtypeStruct((B_pad, x_dim), jnp.bfloat16),  # recon (bf16 store)
        jax.ShapeDtypeStruct((B_pad, z_dim), jnp.float32),   # mu
        jax.ShapeDtypeStruct((B_pad, z_dim), jnp.float32),   # log_var
    )

    args = (x_flat, eps, w1, b1, w2, b2, w31, b31, w32, b32, w4, b4, w5, b5, w6, b6)

    flops = 2 * B_pad * (x_dim * h1 + h1 * h2 + 2 * h2 * z_dim
                         + z_dim * h2 + h2 * hv + hv * x_dim)
    transcendentals = B_pad * (z_dim + x_dim)                # exp (sampling) + tanh
    bytes_accessed = int(
        sum(a.size * a.dtype.itemsize for a in args)
        + sum(s.shape[0] * s.shape[1] * jnp.dtype(s.dtype).itemsize for s in out_shapes))

    recon, mu, log_var = pl.pallas_call(
        vae_kernel,
        out_shape=out_shapes,
        grid=grid,
        in_specs=in_specs,
        out_specs=out_specs,
        compiler_params=pltpu.CompilerParams(
            dimension_semantics=("parallel",),   # batch tiles shard over v7x megacore
            vmem_limit_bytes=32 << 20,
        ),
        cost_estimate=pl.CostEstimate(
            flops=flops,
            transcendentals=transcendentals,
            bytes_accessed=bytes_accessed,
        ),
    )(*args)

    if trim_outputs and B_pad != B:
        recon, mu, log_var = recon[:B], mu[:B], log_var[:B]
    return recon, mu, log_var


def init_params(key, x_dim, h_dim1, h_dim2, z_dim, h_var):
    """Deterministic synthetic init. Weights [in, out] bf16, biases [1, out] f32."""
    def lin(k, fan_in, fan_out):
        kw, kb = jax.random.split(k)
        scale = 1.0 / jnp.sqrt(jnp.float32(fan_in))
        w = jax.random.uniform(kw, (fan_in, fan_out), jnp.float32, -scale, scale)
        b = jax.random.uniform(kb, (1, fan_out), jnp.float32, -scale, scale)
        return w.astype(jnp.bfloat16), b

    keys = jax.random.split(key, 7)
    w1, b1 = lin(keys[0], x_dim, h_dim1)         # fc1
    w2, b2 = lin(keys[1], h_dim1, h_dim2)        # fc2
    w31, b31 = lin(keys[2], h_dim2, z_dim)       # fc31 (mu)
    w32, b32 = lin(keys[3], h_dim2, z_dim)       # fc32 (log_var)
    w4, b4 = lin(keys[4], z_dim, h_dim2)         # fc4
    w5, b5 = lin(keys[5], h_dim2, h_var)         # fc5
    w6, b6 = lin(keys[6], h_var, x_dim)          # fc6
    return (w1, b1, w2, b2, w31, b31, w32, b32, w4, b4, w5, b5, w6, b6)


def vae_forward_ref(x_nchw, eps, params):
    """Pure-JAX reference using the same bf16 weights / bf16 matmul inputs, f32 accum."""
    (w1, b1, w2, b2, w31, b31, w32, b32, w4, b4, w5, b5, w6, b6) = params
    bf16, f32 = jnp.bfloat16, jnp.float32

    def dense(a, w, b):
        return jnp.dot(a.astype(bf16), w.astype(bf16),
                       preferred_element_type=f32) + b.astype(f32)

    x = x_nchw.reshape(x_nchw.shape[0], -1)
    h = jax.nn.relu(dense(x, w1, b1))
    h = jax.nn.relu(dense(h, w2, b2))
    mu = dense(h, w31, b31)
    log_var = dense(h, w32, b32)
    z = eps * jnp.exp(0.5 * log_var) + mu
    d = jax.nn.relu(dense(z, w4, b4))
    d = jax.nn.relu(dense(d, w5, b5))
    recon = jax.nn.sigmoid(dense(d, w6, b6))
    return recon, mu, log_var


if __name__ == "__main__":
    # Small MNIST-like config: x_dim fixed at 784 by x.view(-1, 784) in forward().
    B = 8
    x_dim, h_dim1, h_dim2, z_dim = 784, 256, 128, 32
    h_var = h_dim1  # h_var=None default in the module

    key = jax.random.PRNGKey(0)
    k_params, k_x, k_eps = jax.random.split(key, 3)

    raw_params = init_params(k_params, x_dim, h_dim1, h_dim2, z_dim, h_var)
    packed_params = prepare_params(raw_params)   # one-time packing, off the hot path

    x = jax.random.uniform(k_x, (B, 1, 28, 28), jnp.float32)   # NCHW input
    eps = jax.random.normal(k_eps, (B, z_dim), jnp.float32)    # randn_like(std)

    fwd = jax.jit(vae_forward)
    recon, mu, log_var = fwd(x, eps, packed_params)
    jax.block_until_ready((recon, mu, log_var))

    # Verify against a pure-JAX reference that uses the same bf16 weights.
    r_ref, mu_r, lv_r = vae_forward_ref(x, eps, raw_params)
    assert recon.shape == (B, x_dim) and recon.dtype == jnp.bfloat16
    assert mu.shape == (B, z_dim) and log_var.shape == (B, z_dim)
    # recon is stored bf16 (≈2^-9 quantization in [0,1]) -> slightly looser tol.
    assert jnp.allclose(recon.astype(jnp.float32), r_ref, atol=4e-3, rtol=4e-3)
    assert jnp.allclose(mu, mu_r, atol=2e-3, rtol=2e-3)
    assert jnp.allclose(log_var, lv_r, atol=2e-3, rtol=2e-3)

    print("KERNEL_OK")
</pallas_src>

<mosaic_0001>
module attributes {stable_mosaic.version = 11 : i64} {
  func.func @vae_kernel(%arg0: i32, %arg1: memref<16x784xf32, #tpu.memory_space<vmem>>, %arg2: memref<16x32xf32, #tpu.memory_space<vmem>>, %arg3: memref<784x256xbf16, #tpu.memory_space<vmem>>, %arg4: memref<1x256xf32, #tpu.memory_space<vmem>>, %arg5: memref<256x128xbf16, #tpu.memory_space<vmem>>, %arg6: memref<1x128xf32, #tpu.memory_space<vmem>>, %arg7: memref<128x32xbf16, #tpu.memory_space<vmem>>, %arg8: memref<1x32xf32, #tpu.memory_space<vmem>>, %arg9: memref<128x32xbf16, #tpu.memory_space<vmem>>, %arg10: memref<1x32xf32, #tpu.memory_space<vmem>>, %arg11: memref<32x128xbf16, #tpu.memory_space<vmem>>, %arg12: memref<1x128xf32, #tpu.memory_space<vmem>>, %arg13: memref<128x256xbf16, #tpu.memory_space<vmem>>, %arg14: memref<1x256xf32, #tpu.memory_space<vmem>>, %arg15: memref<256x784xbf16, #tpu.memory_space<vmem>>, %arg16: memref<1x784xf32, #tpu.memory_space<vmem>>, %arg17: memref<16x784xbf16, #tpu.memory_space<vmem>>, %arg18: memref<16x32xf32, #tpu.memory_space<vmem>>, %arg19: memref<16x32xf32, #tpu.memory_space<vmem>>) attributes {dimension_semantics = [#tpu.dimension_semantics<parallel>], iteration_bounds = array<i64: 1>, scalar_prefetch = 0 : i64, scratch_operands = 0 : i64, tpu.core_type = #tpu.core_type<tc>, window_params = [{transform_indices = @transform_0, window_bounds = array<i64: 16, 784>}, {transform_indices = @transform_1, window_bounds = array<i64: 16, 32>}, {pipeline_mode = #tpu.pipeline_mode<synchronous>, transform_indices = @transform_2, window_bounds = array<i64: 784, 256>}, {pipeline_mode = #tpu.pipeline_mode<synchronous>, transform_indices = @transform_3, window_bounds = array<i64: 1, 256>}, {pipeline_mode = #tpu.pipeline_mode<synchronous>, transform_indices = @transform_4, window_bounds = array<i64: 256, 128>}, {pipeline_mode = #tpu.pipeline_mode<synchronous>, transform_indices = @transform_5, window_bounds = array<i64: 1, 128>}, {pipeline_mode = #tpu.pipeline_mode<synchronous>, transform_indices = @transform_6, window_bounds = array<i64: 128, 32>}, {pipeline_mode = #tpu.pipeline_mode<synchronous>, transform_indices = @transform_7, window_bounds = array<i64: 1, 32>}, {pipeline_mode = #tpu.pipeline_mode<synchronous>, transform_indices = @transform_8, window_bounds = array<i64: 128, 32>}, {pipeline_mode = #tpu.pipeline_mode<synchronous>, transform_indices = @transform_9, window_bounds = array<i64: 1, 32>}, {pipeline_mode = #tpu.pipeline_mode<synchronous>, transform_indices = @transform_10, window_bounds = array<i64: 32, 128>}, {pipeline_mode = #tpu.pipeline_mode<synchronous>, transform_indices = @transform_11, window_bounds = array<i64: 1, 128>}, {pipeline_mode = #tpu.pipeline_mode<synchronous>, transform_indices = @transform_12, window_bounds = array<i64: 128, 256>}, {pipeline_mode = #tpu.pipeline_mode<synchronous>, transform_indices = @transform_13, window_bounds = array<i64: 1, 256>}, {pipeline_mode = #tpu.pipeline_mode<synchronous>, transform_indices = @transform_14, window_bounds = array<i64: 256, 784>}, {pipeline_mode = #tpu.pipeline_mode<synchronous>, transform_indices = @transform_15, window_bounds = array<i64: 1, 784>}, {transform_indices = @transform_16, window_bounds = array<i64: 16, 784>}, {transform_indices = @transform_17, window_bounds = array<i64: 16, 32>}, {transform_indices = @transform_18, window_bounds = array<i64: 16, 32>}]} {
    %c0 = arith.constant 0 : index
    %c0_0 = arith.constant 0 : index
    %0 = vector.load %arg1[%c0, %c0_0] : memref<16x784xf32, #tpu.memory_space<vmem>>, vector<16x784xf32>
    %1 = arith.truncf %0 : vector<16x784xf32> to vector<16x784xbf16>
    %c0_1 = arith.constant 0 : index
    %c0_2 = arith.constant 0 : index
    %2 = vector.load %arg3[%c0_1, %c0_2] : memref<784x256xbf16, #tpu.memory_space<vmem>>, vector<784x256xbf16>
    %cst = arith.constant dense<0.000000e+00> : vector<16x256xf32>
    %3 = tpu.matmul %1, %2, %cst {dimension_numbers = #tpu.dot_dimension_numbers<[1], [0], [0], [1], [0, 0, 1, 1], [], []>} : vector<16x784xbf16>, vector<784x256xbf16>, vector<16x256xf32> -> vector<16x256xf32>
    %c0_3 = arith.constant 0 : index
    %c0_4 = arith.constant 0 : index
    %4 = vector.load %arg4[%c0_3, %c0_4] : memref<1x256xf32, #tpu.memory_space<vmem>>, vector<1x256xf32>
    %5 = vector.broadcast %4 : vector<1x256xf32> to vector<16x256xf32>
    %6 = arith.addf %3, %5 : vector<16x256xf32>
    %cst_5 = arith.constant 0.000000e+00 : f32
    %7 = vector.broadcast %cst_5 : f32 to vector<16x256xf32>
    %8 = arith.maximumf %6, %7 : vector<16x256xf32>
    %9 = arith.truncf %8 : vector<16x256xf32> to vector<16x256xbf16>
    %c0_6 = arith.constant 0 : index
    %c0_7 = arith.constant 0 : index
    %10 = vector.load %arg5[%c0_6, %c0_7] : memref<256x128xbf16, #tpu.memory_space<vmem>>, vector<256x128xbf16>
    %cst_8 = arith.constant dense<0.000000e+00> : vector<16x128xf32>
    %11 = tpu.matmul %9, %10, %cst_8 {dimension_numbers = #tpu.dot_dimension_numbers<[1], [0], [0], [1], [0, 0, 1, 1], [], []>} : vector<16x256xbf16>, vector<256x128xbf16>, vector<16x128xf32> -> vector<16x128xf32>
    %c0_9 = arith.constant 0 : index
    %c0_10 = arith.constant 0 : index
    %12 = vector.load %arg6[%c0_9, %c0_10] : memref<1x128xf32, #tpu.memory_space<vmem>>, vector<1x128xf32>
    %13 = vector.broadcast %12 : vector<1x128xf32> to vector<16x128xf32>
    %14 = arith.addf %11, %13 : vector<16x128xf32>
    %cst_11 = arith.constant 0.000000e+00 : f32
    %15 = vector.broadcast %cst_11 : f32 to vector<16x128xf32>
    %16 = arith.maximumf %14, %15 : vector<16x128xf32>
    %17 = arith.truncf %16 : vector<16x128xf32> to vector<16x128xbf16>
    %c0_12 = arith.constant 0 : index
    %c0_13 = arith.constant 0 : index
    %18 = vector.load %arg7[%c0_12, %c0_13] : memref<128x32xbf16, #tpu.memory_space<vmem>>, vector<128x32xbf16>
    %cst_14 = arith.constant dense<0.000000e+00> : vector<16x32xf32>
    %19 = tpu.matmul %17, %18, %cst_14 {dimension_numbers = #tpu.dot_dimension_numbers<[1], [0], [0], [1], [0, 0, 1, 1], [], []>} : vector<16x128xbf16>, vector<128x32xbf16>, vector<16x32xf32> -> vector<16x32xf32>
    %c0_15 = arith.constant 0 : index
    %c0_16 = arith.constant 0 : index
    %20 = vector.load %arg8[%c0_15, %c0_16] : memref<1x32xf32, #tpu.memory_space<vmem>>, vector<1x32xf32>
    %21 = vector.broadcast %20 : vector<1x32xf32> to vector<16x32xf32>
    %22 = arith.addf %19, %21 : vector<16x32xf32>
    %c0_17 = arith.constant 0 : index
    %c0_18 = arith.constant 0 : index
    %23 = vector.load %arg9[%c0_17, %c0_18] : memref<128x32xbf16, #tpu.memory_space<vmem>>, vector<128x32xbf16>
    %cst_19 = arith.constant dense<0.000000e+00> : vector<16x32xf32>
    %24 = tpu.matmul %17, %23, %cst_19 {dimension_numbers = #tpu.dot_dimension_numbers<[1], [0], [0], [1], [0, 0, 1, 1], [], []>} : vector<16x128xbf16>, vector<128x32xbf16>, vector<16x32xf32> -> vector<16x32xf32>
    %c0_20 = arith.constant 0 : index
    %c0_21 = arith.constant 0 : index
    %25 = vector.load %arg10[%c0_20, %c0_21] : memref<1x32xf32, #tpu.memory_space<vmem>>, vector<1x32xf32>
    %26 = vector.broadcast %25 : vector<1x32xf32> to vector<16x32xf32>
    %27 = arith.addf %24, %26 : vector<16x32xf32>
    %cst_22 = arith.constant 5.000000e-01 : f32
    %28 = vector.broadcast %cst_22 : f32 to vector<16x32xf32>
    %29 = arith.mulf %28, %27 : vector<16x32xf32>
    %30 = math.exp %29 : vector<16x32xf32>
    %c0_23 = arith.constant 0 : index
    %c0_24 = arith.constant 0 : index
    %31 = vector.load %arg2[%c0_23, %c0_24] : memref<16x32xf32, #tpu.memory_space<vmem>>, vector<16x32xf32>
    %32 = arith.mulf %31, %30 : vector<16x32xf32>
    %33 = arith.addf %32, %22 : vector<16x32xf32>
    %34 = arith.truncf %33 : vector<16x32xf32> to vector<16x32xbf16>
    %c0_25 = arith.constant 0 : index
    %c0_26 = arith.constant 0 : index
    %35 = vector.load %arg11[%c0_25, %c0_26] : memref<32x128xbf16, #tpu.memory_space<vmem>>, vector<32x128xbf16>
    %cst_27 = arith.constant dense<0.000000e+00> : vector<16x128xf32>
    %36 = tpu.matmul %34, %35, %cst_27 {dimension_numbers = #tpu.dot_dimension_numbers<[1], [0], [0], [1], [0, 0, 1, 1], [], []>} : vector<16x32xbf16>, vector<32x128xbf16>, vector<16x128xf32> -> vector<16x128xf32>
    %c0_28 = arith.constant 0 : index
    %c0_29 = arith.constant 0 : index
    %37 = vector.load %arg12[%c0_28, %c0_29] : memref<1x128xf32, #tpu.memory_space<vmem>>, vector<1x128xf32>
    %38 = vector.broadcast %37 : vector<1x128xf32> to vector<16x128xf32>
    %39 = arith.addf %36, %38 : vector<16x128xf32>
    %cst_30 = arith.constant 0.000000e+00 : f32
    %40 = vector.broadcast %cst_30 : f32 to vector<16x128xf32>
    %41 = arith.maximumf %39, %40 : vector<16x128xf32>
    %42 = arith.truncf %41 : vector<16x128xf32> to vector<16x128xbf16>
    %c0_31 = arith.constant 0 : index
    %c0_32 = arith.constant 0 : index
    %43 = vector.load %arg13[%c0_31, %c0_32] : memref<128x256xbf16, #tpu.memory_space<vmem>>, vector<128x256xbf16>
    %cst_33 = arith.constant dense<0.000000e+00> : vector<16x256xf32>
    %44 = tpu.matmul %42, %43, %cst_33 {dimension_numbers = #tpu.dot_dimension_numbers<[1], [0], [0], [1], [0, 0, 1, 1], [], []>} : vector<16x128xbf16>, vector<128x256xbf16>, vector<16x256xf32> -> vector<16x256xf32>
    %c0_34 = arith.constant 0 : index
    %c0_35 = arith.constant 0 : index
    %45 = vector.load %arg14[%c0_34, %c0_35] : memref<1x256xf32, #tpu.memory_space<vmem>>, vector<1x256xf32>
    %46 = vector.broadcast %45 : vector<1x256xf32> to vector<16x256xf32>
    %47 = arith.addf %44, %46 : vector<16x256xf32>
    %cst_36 = arith.constant 0.000000e+00 : f32
    %48 = vector.broadcast %cst_36 : f32 to vector<16x256xf32>
    %49 = arith.maximumf %47, %48 : vector<16x256xf32>
    %50 = arith.truncf %49 : vector<16x256xf32> to vector<16x256xbf16>
    %c0_37 = arith.constant 0 : index
    %c0_38 = arith.constant 0 : index
    %51 = vector.load %arg15[%c0_37, %c0_38] : memref<256x784xbf16, #tpu.memory_space<vmem>>, vector<256x784xbf16>
    %cst_39 = arith.constant dense<0.000000e+00> : vector<16x784xf32>
    %52 = tpu.matmul %50, %51, %cst_39 {dimension_numbers = #tpu.dot_dimension_numbers<[1], [0], [0], [1], [0, 0, 1, 1], [], []>} : vector<16x256xbf16>, vector<256x784xbf16>, vector<16x784xf32> -> vector<16x784xf32>
    %c0_40 = arith.constant 0 : index
    %c0_41 = arith.constant 0 : index
    %53 = vector.load %arg16[%c0_40, %c0_41] : memref<1x784xf32, #tpu.memory_space<vmem>>, vector<1x784xf32>
    %54 = vector.broadcast %53 : vector<1x784xf32> to vector<16x784xf32>
    %55 = arith.addf %52, %54 : vector<16x784xf32>
    %cst_42 = arith.constant 5.000000e-01 : f32
    %56 = vector.broadcast %cst_42 : f32 to vector<16x784xf32>
    %57 = arith.mulf %56, %55 : vector<16x784xf32>
    %58 = math.tanh %57 : vector<16x784xf32>
    %cst_43 = arith.constant 5.000000e-01 : f32
    %59 = vector.broadcast %cst_43 : f32 to vector<16x784xf32>
    %60 = arith.mulf %59, %58 : vector<16x784xf32>
    %cst_44 = arith.constant 5.000000e-01 : f32
    %61 = vector.broadcast %cst_44 : f32 to vector<16x784xf32>
    %62 = arith.addf %60, %61 : vector<16x784xf32>
    %63 = arith.truncf %62 : vector<16x784xf32> to vector<16x784xbf16>
    %c0_45 = arith.constant 0 : index
    %c0_46 = arith.constant 0 : index
    %64 = vector.load %arg17[%c0_45, %c0_46] : memref<16x784xbf16, #tpu.memory_space<vmem>>, vector<16x784xbf16>
    tpu.vector_store %arg17[%c0_45, %c0_46], %63 {strides = array<i32>} : memref<16x784xbf16, #tpu.memory_space<vmem>>, vector<16x784xbf16>,
    %c0_47 = arith.constant 0 : index
    %c0_48 = arith.constant 0 : index
    %65 = vector.load %arg18[%c0_47, %c0_48] : memref<16x32xf32, #tpu.memory_space<vmem>>, vector<16x32xf32>
    tpu.vector_store %arg18[%c0_47, %c0_48], %22 {strides = array<i32>} : memref<16x32xf32, #tpu.memory_space<vmem>>, vector<16x32xf32>,
    %c0_49 = arith.constant 0 : index
    %c0_50 = arith.constant 0 : index
    %66 = vector.load %arg19[%c0_49, %c0_50] : memref<16x32xf32, #tpu.memory_space<vmem>>, vector<16x32xf32>
    tpu.vector_store %arg19[%c0_49, %c0_50], %27 {strides = array<i32>} : memref<16x32xf32, #tpu.memory_space<vmem>>, vector<16x32xf32>,
    return
  }
  func.func @transform_0(%arg0: i32) -> (i32, i32) {
    %c0_i32 = arith.constant 0 : i32
    %c0_i32_0 = arith.constant 0 : i32
    return %arg0, %c0_i32 : i32, i32
  }
  func.func @transform_1(%arg0: i32) -> (i32, i32) {
    %c0_i32 = arith.constant 0 : i32
    %c0_i32_0 = arith.constant 0 : i32
    return %arg0, %c0_i32 : i32, i32
  }
  func.func @transform_2(%arg0: i32) -> (i32, i32) {
    %c0_i32 = arith.constant 0 : i32
    %c0_i32_0 = arith.constant 0 : i32
    %c0_i32_1 = arith.constant 0 : i32
    return %c0_i32, %c0_i32_0 : i32, i32
  }
  func.func @transform_3(%arg0: i32) -> (i32, i32) {
    %c0_i32 = arith.constant 0 : i32
    %c0_i32_0 = arith.constant 0 : i32
    %c0_i32_1 = arith.constant 0 : i32
    return %c0_i32, %c0_i32_0 : i32, i32
  }
  func.func @transform_4(%arg0: i32) -> (i32, i32) {
    %c0_i32 = arith.constant 0 : i32
    %c0_i32_0 = arith.constant 0 : i32
    %c0_i32_1 = arith.constant 0 : i32
    return %c0_i32, %c0_i32_0 : i32, i32
  }
  func.func @transform_5(%arg0: i32) -> (i32, i32) {
    %c0_i32 = arith.constant 0 : i32
    %c0_i32_0 = arith.constant 0 : i32
    %c0_i32_1 = arith.constant 0 : i32
    return %c0_i32, %c0_i32_0 : i32, i32
  }
  func.func @transform_6(%arg0: i32) -> (i32, i32) {
    %c0_i32 = arith.constant 0 : i32
    %c0_i32_0 = arith.constant 0 : i32
    %c0_i32_1 = arith.constant 0 : i32
    return %c0_i32, %c0_i32_0 : i32, i32
  }
  func.func @transform_7(%arg0: i32) -> (i32, i32) {
    %c0_i32 = arith.constant 0 : i32
    %c0_i32_0 = arith.constant 0 : i32
    %c0_i32_1 = arith.constant 0 : i32
    return %c0_i32, %c0_i32_0 : i32, i32
  }
  func.func @transform_8(%arg0: i32) -> (i32, i32) {
    %c0_i32 = arith.constant 0 : i32
    %c0_i32_0 = arith.constant 0 : i32
    %c0_i32_1 = arith.constant 0 : i32
    return %c0_i32, %c0_i32_0 : i32, i32
  }
  func.func @transform_9(%arg0: i32) -> (i32, i32) {
    %c0_i32 = arith.constant 0 : i32
    %c0_i32_0 = arith.constant 0 : i32
    %c0_i32_1 = arith.constant 0 : i32
    return %c0_i32, %c0_i32_0 : i32, i32
  }
  func.func @transform_10(%arg0: i32) -> (i32, i32) {
    %c0_i32 = arith.constant 0 : i32
    %c0_i32_0 = arith.constant 0 : i32
    %c0_i32_1 = arith.constant 0 : i32
    return %c0_i32, %c0_i32_0 : i32, i32
  }
  func.func @transform_11(%arg0: i32) -> (i32, i32) {
    %c0_i32 = arith.constant 0 : i32
    %c0_i32_0 = arith.constant 0 : i32
    %c0_i32_1 = arith.constant 0 : i32
    return %c0_i32, %c0_i32_0 : i32, i32
  }
  func.func @transform_12(%arg0: i32) -> (i32, i32) {
    %c0_i32 = arith.constant 0 : i32
    %c0_i32_0 = arith.constant 0 : i32
    %c0_i32_1 = arith.constant 0 : i32
    return %c0_i32, %c0_i32_0 : i32, i32
  }
  func.func @transform_13(%arg0: i32) -> (i32, i32) {
    %c0_i32 = arith.constant 0 : i32
    %c0_i32_0 = arith.constant 0 : i32
    %c0_i32_1 = arith.constant 0 : i32
    return %c0_i32, %c0_i32_0 : i32, i32
  }
  func.func @transform_14(%arg0: i32) -> (i32, i32) {
    %c0_i32 = arith.constant 0 : i32
    %c0_i32_0 = arith.constant 0 : i32
    %c0_i32_1 = arith.constant 0 : i32
    return %c0_i32, %c0_i32_0 : i32, i32
  }
  func.func @transform_15(%arg0: i32) -> (i32, i32) {
    %c0_i32 = arith.constant 0 : i32
    %c0_i32_0 = arith.constant 0 : i32
    %c0_i32_1 = arith.constant 0 : i32
    return %c0_i32, %c0_i32_0 : i32, i32
  }
  func.func @transform_16(%arg0: i32) -> (i32, i32) {
    %c0_i32 = arith.constant 0 : i32
    %c0_i32_0 = arith.constant 0 : i32
    return %arg0, %c0_i32 : i32, i32
  }
  func.func @transform_17(%arg0: i32) -> (i32, i32) {
    %c0_i32 = arith.constant 0 : i32
    %c0_i32_0 = arith.constant 0 : i32
    return %arg0, %c0_i32 : i32, i32
  }
  func.func @transform_18(%arg0: i32) -> (i32, i32) {
    %c0_i32 = arith.constant 0 : i32
    %c0_i32_0 = arith.constant 0 : i32
    return %arg0, %c0_i32 : i32, i32
  }
}

</mosaic_0001>

<bundles_post_ra>
// kernel: vae_forward.1
= control target key start
LH: loop header
LB: loop body
LE: loop exit
PB: predicated region body
PF: predicated region fallthrough
CT: control target
= control target key end

     0   :  { %vm672_vm0 = vcmask 130048   ;;  %vm1238_vm1 = vcmask 261120   ;;  %vm2378_vm2 = vcmask 125952   ;;  %s5459_s2 = inlined_call_operand.vmem [shape: bf16[784,256], index: 2, kind: input, shape index: {}]   ;;  %s5460_s0 = inlined_call_operand.vmem [shape: f32[16,784], index: 0, kind: input, shape index: {}]   ;;  %s5461_s5 = inlined_call_operand.vmem [shape: f32[1,128], index: 5, kind: input, shape index: {}]   ;;  %s5462_s4 = inlined_call_operand.vmem [shape: bf16[256,128], index: 4, kind: input, shape index: {}]   ;;  %s5463_s3 = inlined_call_operand.vmem [shape: f32[1,256], index: 3, kind: input, shape index: {}]   ;;  %s5464_s7 = inlined_call_operand.vmem [shape: f32[1,32], index: 7, kind: input, shape index: {}]   ;;  %s5465_s6 = inlined_call_operand.vmem [shape: bf16[128,32], index: 6, kind: input, shape index: {}]   ;;  %s5466_s8 = inlined_call_operand.vmem [shape: bf16[128,32], index: 8, kind: input, shape index: {}]   ;;  %s5467_s9 = inlined_call_operand.vmem [shape: f32[1,32], index: 9, kind: input, shape index: {}]   ;;  %s5468_s11 = inlined_call_operand.vmem [shape: f32[1,128], index: 11, kind: input, shape index: {}]   ;;  %s5469_s10 = inlined_call_operand.vmem [shape: bf16[32,128], index: 10, kind: input, shape index: {}]   ;;  %s5470_s12 = inlined_call_operand.vmem [shape: bf16[128,256], index: 12, kind: input, shape index: {}]   ;;  %s5471_s17 = inlined_call_operand.vmem [shape: f32[16,32], index: 17, kind: output, shape index: {1}]   ;;  %s5472_s18 = inlined_call_operand.vmem [shape: f32[16,32], index: 18, kind: output, shape index: {2}]   ;;  %s5473_s1 = inlined_call_operand.vmem [shape: f32[16,32], index: 1, kind: input, shape index: {}]   ;;  %s5474_s14 = inlined_call_operand.vmem [shape: bf16[256,784], index: 14, kind: input, shape index: {}]   ;;  %s5475_s13 = inlined_call_operand.vmem [shape: f32[1,256], index: 13, kind: input, shape index: {}]   ;;  %s5476_s15 = inlined_call_operand.vmem [shape: f32[1,784], index: 15, kind: input, shape index: {}]   ;;  %s5477_s16 = inlined_call_operand.vmem [shape: bf16[16,784], index: 16, kind: output, shape index: {0}]  }
   0x1   :  { %5480 = sst [smem:[#allocation2_spill]] %s5459_s2 }
   0x2   :  { %5481 = sst [smem:[#allocation3_spill]] %s5460_s0 }
   0x3   :  { %5482 = sst [smem:[#allocation4_spill]] %s5461_s5 }
   0x4   :  { %s5483_s29 = sld [smem:[#allocation2_spill]] }
   0x5   :  { %s5484_s25 = sld [smem:[#allocation3_spill]] }
   0xa   :  { %v2458_v0 = vld [vmem:[%s5483_s29 + $0x70] sm:$0xf]  ;;  %v3458_v1 = vld [vmem:[%s5483_s29 + $0x74] sm:$0xf0]  ;;  %v2450_v11 = vld [vmem:[%s5483_s29 + $0x60] sm:$0xf] }
   0xb   :  { %v2586_v2 = vld [vmem:[%s5483_s29 + $0x170] sm:$0xf]  ;;  %v2459_v3 = vor.u32 %v3458_v1, %v2458_v0  ;;  %v3490_v4 = vld [vmem:[%s5483_s29 + $0x174] sm:$0xf0]  ;;  %v3456_v13 = vld [vmem:[%s5483_s29 + $0x64] sm:$0xf0] }
   0xc   :  { %v2650_v5 = vld [vmem:[%s5483_s29 + $0x1f0] sm:$0xf]  ;;  %v3506_v6 = vld [vmem:[%s5483_s29 + $0x1f4] sm:$0xf0]  ;;  %v2587_v7 = vor.u32 %v3490_v4, %v2586_v2  ;;  %v2578_v14 = vld [vmem:[%s5483_s29 + $0x160] sm:$0xf]  ;;  %v2451_v16 = vor.u32 %v3456_v13, %v2450_v11 }
   0xd   :  { %v2651_v8 = vor.u32 %v3506_v6, %v2650_v5  ;;  %v2522_v9 = vld [vmem:[%s5483_s29 + $0xf0] sm:$0xf]  ;;  %v3474_v10 = vld [vmem:[%s5483_s29 + $0xf4] sm:$0xf0]  ;;  %676 = vmatpush.bf16.msra.mxu0 %v2459_v3  ;;  %v3488_v15 = vld [vmem:[%s5483_s29 + $0x164] sm:$0xf0] }
   0xe   :  { %v2523_v12 = vor.u32 %v3474_v10, %v2522_v9  ;;  %704 = vmatpush.bf16.msra.mxu2 %v2587_v7  ;;  %v2579_v17 = vor.u32 %v3488_v15, %v2578_v14  ;;  %v2642_v18 = vld [vmem:[%s5483_s29 + $0x1e0] sm:$0xf]  ;;  %v3504_v19 = vld [vmem:[%s5483_s29 + $0x1e4] sm:$0xf0]  ;;  %v2442_v23 = vld [vmem:[%s5483_s29 + $0x50] sm:$0xf] }
   0xf   :  { %718 = vmatpush.bf16.msra.mxu3 %v2651_v8  ;;  %v2514_v20 = vld [vmem:[%s5483_s29 + $0xe0] sm:$0xf]  ;;  %v2643_v21 = vor.u32 %v3504_v19, %v2642_v18  ;;  %v3472_v22 = vld [vmem:[%s5483_s29 + $0xe4] sm:$0xf0]  ;;  %v3454_v24 = vld [vmem:[%s5483_s29 + $0x54] sm:$0xf0] }
  0x10   :  { %690 = vmatpush.bf16.msra.mxu1 %v2523_v12  ;;  %v2515_v25 = vor.u32 %v3472_v22, %v2514_v20  ;;  %v2570_v26 = vld [vmem:[%s5483_s29 + $0x150] sm:$0xf]  ;;  %v3486_v27 = vld [vmem:[%s5483_s29 + $0x154] sm:$0xf0]  ;;  %v2443_v29 = vor.u32 %v3454_v24, %v2442_v23  ;;  %v2434_v35 = vld [vmem:[%s5483_s29 + $0x40] sm:$0xf] }
  0x11   :  { %v2634_v28 = vld [vmem:[%s5483_s29 + $0x1d0] sm:$0xf]  ;;  %677 = vmatpush.bf16.msra.mxu0 %v2451_v16  ;;  %v3502_v30 = vld [vmem:[%s5483_s29 + $0x1d4] sm:$0xf0]  ;;  %v2571_v33 = vor.u32 %v3486_v27, %v2570_v26  ;;  %v3452_v36 = vld [vmem:[%s5483_s29 + $0x44] sm:$0xf0] }
  0x12   :  { %v2506_v31 = vld [vmem:[%s5483_s29 + $0xd0] sm:$0xf]  ;;  %v3470_v32 = vld [vmem:[%s5483_s29 + $0xd4] sm:$0xf0]  ;;  %705 = vmatpush.bf16.msra.mxu2 %v2579_v17  ;;  %v2635_v34 = vor.u32 %v3502_v30, %v2634_v28  ;;  %v2562_v37 = vld [vmem:[%s5483_s29 + $0x140] sm:$0xf]  ;;  %v2435_v44 = vor.u32 %v3452_v36, %v2434_v35 }
  0x13   :  { %719 = vmatpush.bf16.msra.mxu3 %v2643_v21  ;;  %v2507_v38 = vor.u32 %v3470_v32, %v2506_v31  ;;  %v3484_v39 = vld [vmem:[%s5483_s29 + $0x144] sm:$0xf0]  ;;  %v2626_v40 = vld [vmem:[%s5483_s29 + $0x1c0] sm:$0xf]  ;;  %v2426_v47 = vld [vmem:[%s5483_s29 + $0x30] sm:$0xf] }
  0x14   :  { %691 = vmatpush.bf16.msra.mxu1 %v2515_v25  ;;  %v3500_v41 = vld [vmem:[%s5483_s29 + $0x1c4] sm:$0xf0]  ;;  %v2498_v42 = vld [vmem:[%s5483_s29 + $0xc0] sm:$0xf]  ;;  %v2563_v45 = vor.u32 %v3484_v39, %v2562_v37  ;;  %v3450_v48 = vld [vmem:[%s5483_s29 + $0x34] sm:$0xf0] }
  0x15   :  { %v3468_v43 = vld [vmem:[%s5483_s29 + $0xc4] sm:$0xf0]  ;;  %678 = vmatpush.bf16.msra.mxu0 %v2443_v29  ;;  %v2627_v46 = vor.u32 %v3500_v41, %v2626_v40  ;;  %v2554_v49 = vld [vmem:[%s5483_s29 + $0x130] sm:$0xf]  ;;  %v3482_v51 = vld [vmem:[%s5483_s29 + $0x134] sm:$0xf0]  ;;  %v2427_v56 = vor.u32 %v3450_v48, %v2426_v47 }
  0x16   :  { %706 = vmatpush.bf16.msra.mxu2 %v2571_v33  ;;  %v2499_v50 = vor.u32 %v3468_v43, %v2498_v42  ;;  %v2618_v52 = vld [vmem:[%s5483_s29 + $0x1b0] sm:$0xf]  ;;  %v3498_v53 = vld [vmem:[%s5483_s29 + $0x1b4] sm:$0xf0]  ;;  %v2555_v57 = vor.u32 %v3482_v51, %v2554_v49  ;;  %v2418_v59 = vld [vmem:[%s5483_s29 + $0x20] sm:$0xf] }
  0x17   :  { %720 = vmatpush.bf16.msra.mxu3 %v2635_v34  ;;  %v2490_v54 = vld [vmem:[%s5483_s29 + $0xb0] sm:$0xf]  ;;  %v3466_v55 = vld [vmem:[%s5483_s29 + $0xb4] sm:$0xf0]  ;;  %v2619_v58 = vor.u32 %v3498_v53, %v2618_v52  ;;  %v3448_v60 = vld [vmem:[%s5483_s29 + $0x24] sm:$0xf0] }
  0x18   :  { %692 = vmatpush.bf16.msra.mxu1 %v2507_v38  ;;  %v2546_v61 = vld [vmem:[%s5483_s29 + $0x120] sm:$0xf]  ;;  %v2491_v62 = vor.u32 %v3466_v55, %v2490_v54  ;;  %v3480_v63 = vld [vmem:[%s5483_s29 + $0x124] sm:$0xf0]  ;;  %v2419_v4 = vor.u32 %v3448_v60, %v2418_v59  ;;  %v2410_v5 = vld [vmem:[%s5483_s29 + $0x10] sm:$0xf] }
  0x19   :  { %679 = vmatpush.bf16.msra.mxu0 %v2435_v44  ;;  %v2610_v0 = vld [vmem:[%s5483_s29 + $0x1a0] sm:$0xf]  ;;  %v3496_v1 = vld [vmem:[%s5483_s29 + $0x1a4] sm:$0xf0]  ;;  %v2547_v6 = vor.u32 %v3480_v63, %v2546_v61  ;;  %v3446_v8 = vld [vmem:[%s5483_s29 + $0x14] sm:$0xf0] }
  0x1a   :  { %707 = vmatpush.bf16.msra.mxu2 %v2563_v45  ;;  %v2482_v2 = vld [vmem:[%s5483_s29 + $0xa0] sm:$0xf]  ;;  %v3464_v3 = vld [vmem:[%s5483_s29 + $0xa4] sm:$0xf0]  ;;  %v2611_v7 = vor.u32 %v3496_v1, %v2610_v0  ;;  %v2538_v9 = vld [vmem:[%s5483_s29 + $0x110] sm:$0xf]  ;;  %v2411_v18 = vor.u32 %v3446_v8, %v2410_v5 }
  0x1b   :  { %721 = vmatpush.bf16.msra.mxu3 %v2627_v46  ;;  %v3478_v10 = vld [vmem:[%s5483_s29 + $0x114] sm:$0xf0]  ;;  %v2483_v11 = vor.u32 %v3464_v3, %v2482_v2  ;;  %v2602_v12 = vld [vmem:[%s5483_s29 + $0x190] sm:$0xf]  ;;  %v2402_v16 = vld [vmem:[%s5483_s29] sm:$0xf] }
  0x1c   :  { %693 = vmatpush.bf16.msra.mxu1 %v2499_v50  ;;  %v3494_v13 = vld [vmem:[%s5483_s29 + $0x194] sm:$0xf0]  ;;  %v2474_v14 = vld [vmem:[%s5483_s29 + $0x90] sm:$0xf]  ;;  %v3444_v17 = vld [vmem:[%s5483_s29 + $0x4] sm:$0xf0]  ;;  %v2539_v23 = vor.u32 %v3478_v10, %v2538_v9 }
  0x1d   :  { %680 = vmatpush.bf16.msra.mxu0 %v2427_v56  ;;  %v3462_v15 = vld [vmem:[%s5483_s29 + $0x94] sm:$0xf0]  ;;  %v2530_v19 = vld [vmem:[%s5483_s29 + $0x100] sm:$0xf]  ;;  %v3476_v20 = vld [vmem:[%s5483_s29 + $0x104] sm:$0xf0]  ;;  %v2603_v24 = vor.u32 %v3494_v13, %v2602_v12  ;;  %v2403_v35 = vor.u32 %v3444_v17, %v2402_v16 }
  0x1e   :  { %708 = vmatpush.bf16.msra.mxu2 %v2555_v57  ;;  %v2594_v21 = vld [vmem:[%s5483_s29 + $0x180] sm:$0xf]  ;;  %v3492_v22 = vld [vmem:[%s5483_s29 + $0x184] sm:$0xf0]  ;;  %v2714_v25 = vld [vmem:[%s5483_s29 + $0x270] sm:$0xf]  ;;  %v2475_v28 = vor.u32 %v3462_v15, %v2474_v14  ;;  %v2531_v39 = vor.u32 %v3476_v20, %v2530_v19 }
  0x1f   :  { %722 = vmatpush.bf16.msra.mxu3 %v2619_v58  ;;  %v3522_v26 = vld [vmem:[%s5483_s29 + $0x274] sm:$0xf0]  ;;  %v3457_v27 = vld [vmem:[%s5483_s29 + $0x74] sm:$0xf]  ;;  %v2460_v29 = vld [vmem:[%s5483_s29 + $0x78] sm:$0xf0]  ;;  %v2595_v40 = vor.u32 %v3492_v22, %v2594_v21 }
  0x20   :  { %694 = vmatpush.bf16.msra.mxu1 %v2491_v62  ;;  %v2466_v30 = vld [vmem:[%s5483_s29 + $0x80] sm:$0xf]  ;;  %v3460_v31 = vld [vmem:[%s5483_s29 + $0x84] sm:$0xf0]  ;;  %v59_v32 = vld [vmem:[%s5484_s25 + $0x10] sm:$0xff]  ;;  %v2715_v44 = vor.u32 %v3522_v26, %v2714_v25  ;;  %v2463_v45 = vor.u32 %v3457_v27, %v2460_v29 }
  0x21   :  { %681 = vmatpush.bf16.msra.mxu0 %v2419_v4  ;;  %v66_v33 = vld [vmem:[%s5484_s25 + $0x48] sm:$0xff]  ;;  %v2778_v34 = vld [vmem:[%s5483_s29 + $0x2f0] sm:$0xf]  ;;  %v3538_v36 = vld [vmem:[%s5483_s29 + $0x2f4] sm:$0xf0]  ;;  %v2467_v49 = vor.u32 %v3460_v31, %v2466_v30 }
  0x22   :  { %709 = vmatpush.bf16.msra.mxu2 %v2547_v6  ;;  %v2786_v37 = vld [vmem:[%s5483_s29 + $0x300] sm:$0xf]  ;;  %v3540_v38 = vld [vmem:[%s5483_s29 + $0x304] sm:$0xf0]  ;;  %v3473_v41 = vld [vmem:[%s5483_s29 + $0xf4] sm:$0xf]  ;;  %v4083_v54 = vpack.c.bf16 %v66_v33, %v59_v32  ;;  %v2779_v55 = vor.u32 %v3538_v36, %v2778_v34 }
  0x23   :  { %723 = vmatpush.bf16.msra.mxu3 %v2611_v7  ;;  %v2524_v42 = vld [vmem:[%s5483_s29 + $0xf8] sm:$0xf0]  ;;  %v57_v43 = vld [vmem:[%s5484_s25] sm:$0xff]  ;;  %v67_v48 = vld [vmem:[%s5484_s25 + $0x50] sm:$0xff]  ;;  %v2787_v50 = vor.u32 %v3540_v38, %v2786_v37 }
  0x24   :  { %695 = vmatpush.bf16.msra.mxu1 %v2483_v11  ;;  %v64_v46 = vld [vmem:[%s5484_s25 + $0x38] sm:$0xff]  ;;  %v2706_v51 = vld [vmem:[%s5483_s29 + $0x260] sm:$0xf]  ;;  %v3520_v52 = vld [vmem:[%s5483_s29 + $0x264] sm:$0xf0]  ;;  %v2527_v59 = vor.u32 %v3473_v41, %v2524_v42 }
  0x25   :  { %682 = vmatpush.bf16.msra.mxu0 %v2411_v18  ;;  %v60_v47 = vld [vmem:[%s5484_s25 + $0x18] sm:$0xff]  ;;  %v3455_v53 = vld [vmem:[%s5483_s29 + $0x64] sm:$0xf]  ;;  %v2452_v56 = vld [vmem:[%s5483_s29 + $0x68] sm:$0xf0]  ;;  %v4094_v60 = vpack.c.bf16 %v64_v46, %v57_v43  ;;  %v2707_v0 = vor.u32 %v3520_v52, %v2706_v51 }
  0x26   :  { %710 = vmatpush.bf16.msra.mxu2 %v2539_v23  ;;  %v58_v57 = vld [vmem:[%s5484_s25 + $0x8] sm:$0xff]  ;;  %v65_v58 = vld [vmem:[%s5484_s25 + $0x40] sm:$0xff]  ;;  %v4102_v63 = vpack.c.bf16 %v67_v48, %v60_v47  ;;  %v2455_v3 = vor.u32 %v3455_v53, %v2452_v56  ;;  %v2698_v5 = vld [vmem:[%s5483_s29 + $0x250] sm:$0xf] }
  0x27   :  { %724 = vmatpush.bf16.msra.mxu3 %v2603_v24  ;;  %v2770_v61 = vld [vmem:[%s5483_s29 + $0x2e0] sm:$0xf]  ;;  %v3536_v62 = vld [vmem:[%s5483_s29 + $0x2e4] sm:$0xf0]  ;;  %v3471_v1 = vld [vmem:[%s5483_s29 + $0xe4] sm:$0xf]  ;;  %v4110_v4 = vpack.c.bf16 %v65_v58, %v58_v57 }
  0x28   :  { %696 = vmatpush.bf16.msra.mxu1 %v2475_v28  ;;  %v2516_v2 = vld [vmem:[%s5483_s29 + $0xe8] sm:$0xf0]  ;;  %v3518_v6 = vld [vmem:[%s5483_s29 + $0x254] sm:$0xf0]  ;;  %v2771_v7 = vor.u32 %v3536_v62, %v2770_v61  ;;  %v3453_v8 = vld [vmem:[%s5483_s29 + $0x54] sm:$0xf] }
  0x29   :  { %683 = vmatpush.bf16.msra.mxu0 %v2403_v35  ;;  %v2444_v9 = vld [vmem:[%s5483_s29 + $0x58] sm:$0xf0]  ;;  %v2519_v10 = vor.u32 %v3471_v1, %v2516_v2  ;;  %v2762_v11 = vld [vmem:[%s5483_s29 + $0x2d0] sm:$0xf]  ;;  %v3534_v12 = vld [vmem:[%s5483_s29 + $0x2d4] sm:$0xf0]  ;;  %v2699_v13 = vor.u32 %v3518_v6, %v2698_v5 }
  0x2a   :  { %711 = vmatpush.bf16.msra.mxu2 %v2531_v39  ;;  %v3469_v14 = vld [vmem:[%s5483_s29 + $0xd4] sm:$0xf]  ;;  %v2508_v15 = vld [vmem:[%s5483_s29 + $0xd8] sm:$0xf0]  ;;  %v2447_v16 = vor.u32 %v3453_v8, %v2444_v9  ;;  %v2690_v17 = vld [vmem:[%s5483_s29 + $0x240] sm:$0xf]  ;;  %v2763_v19 = vor.u32 %v3534_v12, %v2762_v11 }
  0x2b   :  { %725 = vmatpush.bf16.msra.mxu3 %v2595_v40  ;;  %v3516_v18 = vld [vmem:[%s5483_s29 + $0x244] sm:$0xf0]  ;;  %v3451_v20 = vld [vmem:[%s5483_s29 + $0x44] sm:$0xf]  ;;  %v2436_v21 = vld [vmem:[%s5483_s29 + $0x48] sm:$0xf0]  ;;  %v2511_v22 = vor.u32 %v3469_v14, %v2508_v15 }
  0x2c   :  { %697 = vmatpush.bf16.msra.mxu1 %v2467_v49  ;;  %684 = vmatmul.bf16.vlgmr.msra.gmra.mxu0 %v4094_v60  ;;  %v2754_v23 = vld [vmem:[%s5483_s29 + $0x2c0] sm:$0xf]  ;;  %v3532_v24 = vld [vmem:[%s5483_s29 + $0x2c4] sm:$0xf0]  ;;  %v2691_v25 = vor.u32 %v3516_v18, %v2690_v17  ;;  %v3467_v26 = vld [vmem:[%s5483_s29 + $0xc4] sm:$0xf]  ;;  %v2439_v28 = vor.u32 %v3451_v20, %v2436_v21 }
  0x2d   :  { %732 = vmatpush.bf16.msrb.mxu0 %v2715_v44  ;;  %712 = vmatmul.bf16.vlgmr.msra.gmra.mxu2 %v4083_v54  ;;  %v2500_v27 = vld [vmem:[%s5483_s29 + $0xc8] sm:$0xf0]  ;;  %v2682_v29 = vld [vmem:[%s5483_s29 + $0x230] sm:$0xf]  ;;  %v3514_v30 = vld [vmem:[%s5483_s29 + $0x234] sm:$0xf0]  ;;  %v2755_v31 = vor.u32 %v3532_v24, %v2754_v23 }
  0x2e   :  { %767 = vmatpush.bf16.msrb.mxu2 %v2787_v50  ;;  %726 = vmatmul.bf16.vlgmr.msra.gmra.mxu3 %v4102_v63  ;;  %v3449_v32 = vld [vmem:[%s5483_s29 + $0x34] sm:$0xf]  ;;  %v2428_v33 = vld [vmem:[%s5483_s29 + $0x38] sm:$0xf0]  ;;  %v2746_v34 = vld [vmem:[%s5483_s29 + $0x2b0] sm:$0xf]  ;;  %v2503_v35 = vor.u32 %v3467_v26, %v2500_v27  ;;  %v2683_v39 = vor.u32 %v3514_v30, %v2682_v29 }
  0x2f   :  { %774 = vmatpush.bf16.msrb.mxu3 %v2463_v45  ;;  %698 = vmatmul.bf16.vlgmr.msra.gmra.mxu1 %v4110_v4  ;;  %v3530_v36 = vld [vmem:[%s5483_s29 + $0x2b4] sm:$0xf0]  ;;  %v63_v37 = vld [vmem:[%s5484_s25 + $0x30] sm:$0xff]  ;;  %v70_v38 = vld [vmem:[%s5484_s25 + $0x68] sm:$0xff]  ;;  %v2431_v42 = vor.u32 %v3449_v32, %v2428_v33 }
  0x30   :  { %746 = vmatpush.bf16.msrb.mxu1 %v2779_v55  ;;  %v3465_v40 = vld [vmem:[%s5483_s29 + $0xb4] sm:$0xf]  ;;  %v2492_v41 = vld [vmem:[%s5483_s29 + $0xb8] sm:$0xf0]  ;;  %v2674_v43 = vld [vmem:[%s5483_s29 + $0x220] sm:$0xf]  ;;  %v2747_v45 = vor.u32 %v3530_v36, %v2746_v34  ;;  %v4206_v48 = vpack.c.bf16 %v70_v38, %v63_v37 }
  0x31   :  { %733 = vmatpush.bf16.msrb.mxu0 %v2707_v0  ;;  %v3512_v44 = vld [vmem:[%s5483_s29 + $0x224] sm:$0xf0]  ;;  %v3447_v46 = vld [vmem:[%s5483_s29 + $0x24] sm:$0xf]  ;;  %v2420_v47 = vld [vmem:[%s5483_s29 + $0x28] sm:$0xf0]  ;;  %v2495_v49 = vor.u32 %v3465_v40, %v2492_v41 }
  0x32   :  { %788 = vmatpush.bf16.msra.mxu2 %v2527_v59  ;;  %v2738_v50 = vld [vmem:[%s5483_s29 + $0x2a0] sm:$0xf]  ;;  %v3528_v51 = vld [vmem:[%s5483_s29 + $0x2a4] sm:$0xf0]  ;;  %v2675_v52 = vor.u32 %v3512_v44, %v2674_v43  ;;  %v3463_v53 = vld [vmem:[%s5483_s29 + $0xa4] sm:$0xf]  ;;  %v2423_v56 = vor.u32 %v3447_v46, %v2420_v47 }
  0x33   :  { %775 = vmatpush.bf16.msrb.mxu3 %v2455_v3  ;;  %v2484_v55 = vld [vmem:[%s5483_s29 + $0xa8] sm:$0xf0]  ;;  %v2666_v57 = vld [vmem:[%s5483_s29 + $0x210] sm:$0xf]  ;;  %v3510_v58 = vld [vmem:[%s5483_s29 + $0x214] sm:$0xf0]  ;;  %v2739_v61 = vor.u32 %v3528_v51, %v2738_v50 }
  0x34   :  { %747 = vmatpush.bf16.msrb.mxu1 %v2771_v7  ;;  %v3445_v59 = vld [vmem:[%s5483_s29 + $0x14] sm:$0xf]  ;;  %v2412_v62 = vld [vmem:[%s5483_s29 + $0x18] sm:$0xf0]  ;;  %v2730_v0 = vld [vmem:[%s5483_s29 + $0x290] sm:$0xf]  ;;  %v2487_v2 = vor.u32 %v3463_v53, %v2484_v55  ;;  %v2667_v7 = vor.u32 %v3510_v58, %v2666_v57 }
  0x35   :  { %734 = vmatpush.bf16.msrb.mxu0 %v2699_v13  ;;  %v3526_v1 = vld [vmem:[%s5483_s29 + $0x294] sm:$0xf0]  ;;  %v3461_v3 = vld [vmem:[%s5483_s29 + $0x94] sm:$0xf]  ;;  %v2476_v5 = vld [vmem:[%s5483_s29 + $0x98] sm:$0xf0]  ;;  %v2415_v11 = vor.u32 %v3445_v59, %v2412_v62 }
  0x36   :  { %789 = vmatpush.bf16.msra.mxu2 %v2519_v10  ;;  %v2658_v6 = vld [vmem:[%s5483_s29 + $0x200] sm:$0xf]  ;;  %v3508_v8 = vld [vmem:[%s5483_s29 + $0x204] sm:$0xf0]  ;;  %v3443_v9 = vld [vmem:[%s5483_s29 + $0x4] sm:$0xf]  ;;  %v2731_v15 = vor.u32 %v3526_v1, %v2730_v0 }
  0x37   :  { %776 = vmatpush.bf16.msrb.mxu3 %v2447_v16  ;;  %v2404_v10 = vld [vmem:[%s5483_s29 + $0x8] sm:$0xf0]  ;;  %v3489_v12 = vld [vmem:[%s5483_s29 + $0x174] sm:$0xf]  ;;  %v2588_v13 = vld [vmem:[%s5483_s29 + $0x178] sm:$0xf0]  ;;  %v2659_v23 = vor.u32 %v3508_v8, %v2658_v6 }
  0x38   :  { %748 = vmatpush.bf16.msrb.mxu1 %v2763_v19  ;;  %v3521_v14 = vld [vmem:[%s5483_s29 + $0x274] sm:$0xf]  ;;  %v2716_v16 = vld [vmem:[%s5483_s29 + $0x278] sm:$0xf0]  ;;  %v2722_v17 = vld [vmem:[%s5483_s29 + $0x280] sm:$0xf]  ;;  %v2479_v19 = vor.u32 %v3461_v3, %v2476_v5  ;;  %v2407_v27 = vor.u32 %v3443_v9, %v2404_v10 }
  0x39   :  { %735 = vmatpush.bf16.msrb.mxu0 %v2691_v25  ;;  %v3524_v18 = vld [vmem:[%s5483_s29 + $0x284] sm:$0xf0]  ;;  %v61_v20 = vld [vmem:[%s5484_s25 + $0x20] sm:$0xff]  ;;  %v68_v21 = vld [vmem:[%s5484_s25 + $0x58] sm:$0xff]  ;;  %v2719_v32 = vor.u32 %v3521_v14, %v2716_v16 }
  0x3a   :  { %790 = vmatpush.bf16.msra.mxu2 %v2511_v22  ;;  %v3459_v22 = vld [vmem:[%s5483_s29 + $0x84] sm:$0xf]  ;;  %v2468_v24 = vld [vmem:[%s5483_s29 + $0x88] sm:$0xf0]  ;;  %v3505_v25 = vld [vmem:[%s5483_s29 + $0x1f4] sm:$0xf]  ;;  %v2723_v33 = vor.u32 %v3524_v18, %v2722_v17  ;;  %v4312_v37 = vpack.c.bf16 %v68_v21, %v61_v20 }
  0x3b   :  { %777 = vmatpush.bf16.msrb.mxu3 %v2439_v28  ;;  %v2652_v26 = vld [vmem:[%s5483_s29 + $0x1f8] sm:$0xf0]  ;;  %v2591_v28 = vor.u32 %v3489_v12, %v2588_v13  ;;  %v3537_v29 = vld [vmem:[%s5483_s29 + $0x2f4] sm:$0xf]  ;;  %v69_v34 = vld [vmem:[%s5484_s25 + $0x60] sm:$0xff]  ;;  %v2471_v38 = vor.u32 %v3459_v22, %v2468_v24 }
  0x3c   :  { %749 = vmatpush.bf16.msrb.mxu1 %v2755_v31  ;;  %v2780_v30 = vld [vmem:[%s5483_s29 + $0x2f8] sm:$0xf0]  ;;  %v62_v31 = vld [vmem:[%s5484_s25 + $0x28] sm:$0xff]  ;;  %v2655_v41 = vor.u32 %v3505_v25, %v2652_v26  ;;  %v3503_v43 = vld [vmem:[%s5483_s29 + $0x1e4] sm:$0xf] }
  0x3d   :  { %736 = vmatpush.bf16.msrb.mxu0 %v2683_v39  ;;  %2792 = vmatmul.msk.bf16.vlgmr.msrb.gmra.mxu2 %vm672_vm0, %v4206_v48  ;;  %v2580_v36 = vld [vmem:[%s5483_s29 + $0x168] sm:$0xf0]  ;;  %v3519_v39 = vld [vmem:[%s5483_s29 + $0x264] sm:$0xf]  ;;  %v4323_v44 = vpack.c.bf16 %v69_v34, %v62_v31  ;;  %v3485_v51 = vld [vmem:[%s5483_s29 + $0x154] sm:$0xf] }
  0x3e   :  { %791 = vmatpush.bf16.msra.mxu2 %v2503_v35  ;;  %v3487_v35 = vld [vmem:[%s5483_s29 + $0x164] sm:$0xf]  ;;  %v2708_v40 = vld [vmem:[%s5483_s29 + $0x268] sm:$0xf0]  ;;  %v3517_v53 = vld [vmem:[%s5483_s29 + $0x254] sm:$0xf] }
  0x3f   :  { %778 = vmatpush.bf16.msrb.mxu3 %v2431_v42  ;;  %v2783_v42 = vor.u32 %v3537_v29, %v2780_v30  ;;  %v2644_v46 = vld [vmem:[%s5483_s29 + $0x1e8] sm:$0xf0]  ;;  %v3535_v47 = vld [vmem:[%s5483_s29 + $0x2e4] sm:$0xf]  ;;  %v2711_v50 = vor.u32 %v3519_v39, %v2708_v40  ;;  %v2700_v55 = vld [vmem:[%s5483_s29 + $0x258] sm:$0xf0] }
  0x40   :  { %750 = vmatpush.bf16.msrb.mxu1 %v2747_v45  ;;  %v2583_v45 = vor.u32 %v3487_v35, %v2580_v36  ;;  %v3501_v58 = vld [vmem:[%s5483_s29 + $0x1d4] sm:$0xf]  ;;  %v2764_v0 = vld [vmem:[%s5483_s29 + $0x2d8] sm:$0xf0]  ;;  %v2703_v1 = vor.u32 %v3517_v53, %v2700_v55  ;;  %v2564_v3 = vld [vmem:[%s5483_s29 + $0x148] sm:$0xf0] }
  0x41   :  { %737 = vmatpush.bf16.msrb.mxu0 %v2675_v52  ;;  %v2572_v52 = vld [vmem:[%s5483_s29 + $0x158] sm:$0xf0]  ;;  %v3533_v62 = vld [vmem:[%s5483_s29 + $0x2d4] sm:$0xf]  ;;  %v3515_v5 = vld [vmem:[%s5483_s29 + $0x244] sm:$0xf] }
  0x42   :  { %792 = vmatpush.bf16.msra.mxu2 %v2495_v49  ;;  %v2772_v49 = vld [vmem:[%s5483_s29 + $0x2e8] sm:$0xf0]  ;;  %v2575_v59 = vor.u32 %v3485_v51, %v2572_v52  ;;  %v2767_v8 = vor.u32 %v3533_v62, %v2764_v0  ;;  %v3499_v9 = vld [vmem:[%s5483_s29 + $0x1c4] sm:$0xf]  ;;  %v3481_v13 = vld [vmem:[%s5483_s29 + $0x134] sm:$0xf] }
  0x43   :  { %779 = vmatpush.bf16.msrb.mxu3 %v2423_v56  ;;  %v2647_v56 = vor.u32 %v3503_v43, %v2644_v46  ;;  %v2775_v57 = vor.u32 %v3535_v47, %v2772_v49  ;;  %v2692_v6 = vld [vmem:[%s5483_s29 + $0x248] sm:$0xf0]  ;;  %v2556_v14 = vld [vmem:[%s5483_s29 + $0x138] sm:$0xf0]  ;;  %v3529_v22 = vld [vmem:[%s5483_s29 + $0x2b4] sm:$0xf] }
  0x44   :  { %751 = vmatpush.bf16.msrb.mxu1 %v2739_v61  ;;  %v2636_v61 = vld [vmem:[%s5483_s29 + $0x1d8] sm:$0xf0]  ;;  %v2628_v10 = vld [vmem:[%s5483_s29 + $0x1c8] sm:$0xf0]  ;;  %v2695_v12 = vor.u32 %v3515_v5, %v2692_v6  ;;  %v2559_v20 = vor.u32 %v3481_v13, %v2556_v14  ;;  %v3479_v25 = vld [vmem:[%s5483_s29 + $0x124] sm:$0xf] }
  0x45   :  { %738 = vmatpush.bf16.msrb.mxu0 %v2667_v7  ;;  %v2639_v7 = vor.u32 %v3501_v58, %v2636_v61  ;;  %v2684_v16 = vld [vmem:[%s5483_s29 + $0x238] sm:$0xf0]  ;;  %v2631_v17 = vor.u32 %v3499_v9, %v2628_v10  ;;  %v2548_v26 = vld [vmem:[%s5483_s29 + $0x128] sm:$0xf0]  ;;  %v3495_v31 = vld [vmem:[%s5483_s29 + $0x1a4] sm:$0xf] }
  0x46   :  { %793 = vmatpush.bf16.msra.mxu2 %v2487_v2  ;;  %v3483_v2 = vld [vmem:[%s5483_s29 + $0x144] sm:$0xf]  ;;  %v2620_v21 = vld [vmem:[%s5483_s29 + $0x1b8] sm:$0xf0]  ;;  %v2740_v35 = vld [vmem:[%s5483_s29 + $0x2a8] sm:$0xf0] }
  0x47   :  { %780 = vmatpush.bf16.msrb.mxu3 %v2415_v11  ;;  %v3531_v11 = vld [vmem:[%s5483_s29 + $0x2c4] sm:$0xf]  ;;  %v2540_v39 = vld [vmem:[%s5483_s29 + $0x118] sm:$0xf0]  ;;  %v3509_v40 = vld [vmem:[%s5483_s29 + $0x214] sm:$0xf] }
  0x48   :  { %752 = vmatpush.bf16.msrb.mxu1 %v2731_v15  ;;  %v3513_v15 = vld [vmem:[%s5483_s29 + $0x234] sm:$0xf]  ;;  %v3527_v34 = vld [vmem:[%s5483_s29 + $0x2a4] sm:$0xf]  ;;  %v2604_v47 = vld [vmem:[%s5483_s29 + $0x198] sm:$0xf0] }
  0x49   :  { %739 = vmatpush.bf16.msrb.mxu0 %v2659_v23  ;;  %v2748_v23 = vld [vmem:[%s5483_s29 + $0x2b8] sm:$0xf0]  ;;  %v2687_v24 = vor.u32 %v3513_v15, %v2684_v16  ;;  %v2743_v43 = vor.u32 %v3527_v34, %v2740_v35  ;;  %v3525_v49 = vld [vmem:[%s5483_s29 + $0x294] sm:$0xf]  ;;  %v3475_v52 = vld [vmem:[%s5483_s29 + $0x104] sm:$0xf] }
  0x4a   :  { %794 = vmatpush.bf16.msra.mxu2 %v2479_v19  ;;  %v3497_v19 = vld [vmem:[%s5483_s29 + $0x1b4] sm:$0xf]  ;;  %v2751_v30 = vor.u32 %v3529_v22, %v2748_v23  ;;  %v2532_v53 = vld [vmem:[%s5483_s29 + $0x108] sm:$0xf0]  ;;  %v3507_v55 = vld [vmem:[%s5483_s29 + $0x204] sm:$0xf] }
  0x4b   :  { %781 = vmatpush.bf16.msrb.mxu3 %v2407_v27  ;;  %v3511_v27 = vld [vmem:[%s5483_s29 + $0x224] sm:$0xf]  ;;  %v2623_v29 = vor.u32 %v3497_v19, %v2620_v21  ;;  %v2788_v58 = vld [vmem:[%s5483_s29 + $0x308] sm:$0xf0]  ;;  %v2535_v62 = vor.u32 %v3475_v52, %v2532_v53  ;;  %v3548_v9 = vld [vmem:[%s5462_s4 + $0x38] sm:$0xff] }
  0x4c   :  { %753 = vmatpush.bf16.msrb.mxu1 %v2723_v33  ;;  %740 = vmatmul.bf16.vlgmr.msrb.gmra.mxu0 %v4312_v37  ;;  %v2612_v33 = vld [vmem:[%s5483_s29 + $0x1a8] sm:$0xf0]  ;;  %v3491_v0 = vld [vmem:[%s5483_s29 + $0x184] sm:$0xf]  ;;  %v176_v10 = vld [vmem:[%s5463_s3] sm:$0x3] }
  0x4d   :  { %802 = vmatpush.bf16.msra.mxu0 %v2591_v28  ;;  %v2676_v28 = vld [vmem:[%s5483_s29 + $0x228] sm:$0xf0]  ;;  %v178_v14 = vperm.slane %v176_v10, 0  ;;  %v3556_v22 = vld [vmem:[%s5462_s4 + $0x78] sm:$0xff] }
  0x4e   :  { %795 = vmatpush.bf16.msra.mxu2 %v2471_v38  ;;  %782 = vmatmul.bf16.vlgmr.msrb.gmra.mxu3 %v4094_v60  ;;  %v2756_v60 = vld [vmem:[%s5483_s29 + $0x2c8] sm:$0xf0]  ;;  %v2679_v36 = vor.u32 %v3511_v27, %v2676_v28  ;;  %v3477_v38 = vld [vmem:[%s5483_s29 + $0x114] sm:$0xf] }
  0x4f   :  { %830 = vmatpush.bf16.msra.mxu3 %v2719_v32  ;;  %754 = vmatmul.bf16.vlgmr.msrb.gmra.mxu1 %v4323_v44  ;;  %v2759_v18 = vor.u32 %v3531_v11, %v2756_v60  ;;  %v2551_v32 = vor.u32 %v3479_v25, %v2548_v26  ;;  %v2543_v46 = vor.u32 %v3477_v38, %v2540_v39  ;;  %v2724_v5 = vld [vmem:[%s5483_s29 + $0x288] sm:$0xf0]  ;;  %v3555_v27 = vld [vmem:[%s5462_s4 + $0x70] sm:$0xff]  ;;  %v3553_v38 = vld [vmem:[%s5462_s4 + $0x60] sm:$0xff] }
  0x50   :  { %816 = vmatpush.bf16.msra.mxu1 %v2655_v41  ;;  %v2668_v41 = vld [vmem:[%s5483_s29 + $0x218] sm:$0xf0]  ;;  %v3550_v53 = vld [vmem:[%s5462_s4 + $0x48] sm:$0xff] }
  0x51   :  { %803 = vmatpush.bf16.msra.mxu0 %v2583_v45  ;;  %796 = vmatmul.bf16.vlgmr.msra.gmra.mxu2 %v4110_v4  ;;  %v2567_v4 = vor.u32 %v3483_v2, %v2564_v3  ;;  %v3493_v45 = vld [vmem:[%s5483_s29 + $0x194] sm:$0xf]  ;;  %v2671_v51 = vor.u32 %v3509_v40, %v2668_v41  ;;  %v3523_v3 = vld [vmem:[%s5483_s29 + $0x284] sm:$0xf] }
  0x52   :  { %844 = vmatpush.bf16.msrb.mxu2 %v2783_v42  ;;  %v2615_v42 = vor.u32 %v3495_v31, %v2612_v33  ;;  %v3554_v33 = vld [vmem:[%s5462_s4 + $0x68] sm:$0xff] }
  0x53   :  { %831 = vmatpush.bf16.msra.mxu3 %v2711_v50  ;;  %v2732_v50 = vld [vmem:[%s5483_s29 + $0x298] sm:$0xf0] }
  0x54   :  { %817 = vmatpush.bf16.msra.mxu1 %v2647_v56  ;;  %v2660_v56 = vld [vmem:[%s5483_s29 + $0x208] sm:$0xf0]  ;;  %v2735_v61 = vor.u32 %v3525_v49, %v2732_v50  ;;  %v3551_v50 = vld [vmem:[%s5462_s4 + $0x50] sm:$0xff] }
  0x55   :  { %804 = vmatpush.bf16.msra.mxu0 %v2575_v59  ;;  %v2607_v59 = vor.u32 %v3493_v45, %v2604_v47  ;;  %v2663_v2 = vor.u32 %v3507_v55, %v2660_v56  ;;  %v3552_v45 = vld [vmem:[%s5462_s4 + $0x58] sm:$0xff]  ;;  %v3549_v56 = vld [vmem:[%s5462_s4 + $0x40] sm:$0xff] }
  0x56   :  { %845 = vmatpush.bf16.msrb.mxu2 %v2775_v57  ;;  %v3539_v57 = vld [vmem:[%s5483_s29 + $0x304] sm:$0xf] }
  0x57   :  { %832 = vmatpush.bf16.msra.mxu3 %v2703_v1  ;;  %v2596_v1 = vld [vmem:[%s5483_s29 + $0x188] sm:$0xf0]  ;;  %v2791_v6 = vor.u32 %v3539_v57, %v2788_v58  ;;  %v179_v57 = vperm.slane %v176_v10, 1 }
  0x58   :  { %818 = vmatpush.bf16.msra.mxu1 %v2639_v7  ;;  %v2599_v7 = vor.u32 %v3491_v0, %v2596_v1 }
  0x59   :  { %805 = vmatpush.bf16.msra.mxu0 %v2567_v4  ;;  %v3547_v4 = vld [vmem:[%s5462_s4 + $0x30] sm:$0xff] }
  0x5a   :  { %846 = vmatpush.bf16.msrb.mxu2 %v2767_v8  ;;  %v2727_v8 = vor.u32 %v3523_v3, %v2724_v5 }
  0x5b   :  { %833 = vmatpush.bf16.msra.mxu3 %v2695_v12  ;;  %v3541_v12 = vld [vmem:[%s5462_s4] sm:$0xff] }
  0x5c   :  { %819 = vmatpush.bf16.msra.mxu1 %v2631_v17 }
  0x5d   :  { %806 = vmatpush.bf16.msra.mxu0 %v2559_v20 }
  0x5e   :  { %847 = vmatpush.bf16.msrb.mxu2 %v2759_v18 }
  0x5f   :  { %834 = vmatpush.bf16.msra.mxu3 %v2687_v24 }
  0x60   :  { %820 = vmatpush.bf16.msra.mxu1 %v2623_v29 }
  0x61   :  { %807 = vmatpush.bf16.msra.mxu0 %v2551_v32 }
  0x62   :  { %848 = vmatpush.bf16.msrb.mxu2 %v2751_v30 }
  0x63   :  { %835 = vmatpush.bf16.msra.mxu3 %v2679_v36 }
  0x64   :  { %821 = vmatpush.bf16.msra.mxu1 %v2615_v42 }
  0x65   :  { %808 = vmatpush.bf16.msra.mxu0 %v2543_v46 }
  0x66   :  { %849 = vmatpush.bf16.msrb.mxu2 %v2743_v43 }
  0x67   :  { %836 = vmatpush.bf16.msra.mxu3 %v2671_v51 }
  0x68   :  { %822 = vmatpush.bf16.msra.mxu1 %v2607_v59 }
  0x69   :  { %809 = vmatpush.bf16.msra.mxu0 %v2535_v62 }
  0x6a   :  { %850 = vmatpush.bf16.msrb.mxu2 %v2735_v61 }
  0x6b   :  { %837 = vmatpush.bf16.msra.mxu3 %v2663_v2 }
  0x6c   :  { %823 = vmatpush.bf16.msra.mxu1 %v2599_v7  ;;  %810 = vmatmul.bf16.vlgmr.msra.gmra.mxu0 %v4083_v54  ;;  %v3546_v54 = vld [vmem:[%s5462_s4 + $0x28] sm:$0xff] }
  0x6d   :  { %865 = vmatpush.bf16.msrb.mxu0 %v2791_v6 }
  0x6e   :  { %838 = vmatmul.bf16.vlgmr.msra.gmra.mxu3 %v4312_v37  ;;  %851 = vmatpush.bf16.msrb.mxu2 %v2727_v8  ;;  %v3543_v37 = vld [vmem:[%s5462_s4 + $0x10] sm:$0xff] }
  0x6f   :  { %824 = vmatmul.bf16.vlgmr.msra.gmra.mxu1 %v4102_v63  ;;  %v3545_v63 = vld [vmem:[%s5462_s4 + $0x20] sm:$0xff]  ;;  %1024 = vmatpush.bf16.msrb.mxu3 %v3556_v22  ;;  %v3571_v22 = vld [vmem:[%s5466_s8 + $0x30] sm:$0xff] }
  0x70   :  { %1010 = vmatpush.bf16.msrb.mxu1 %v3548_v9 }
  0x71   :  { %852 = vmatmul.bf16.vlgmr.msrb.gmra.mxu2 %v4323_v44  ;;  %v3542_v44 = vld [vmem:[%s5462_s4 + $0x8] sm:$0xff] }
  0x73   :  { %1025 = vmatpush.bf16.msrb.mxu3 %v3555_v27  ;;  %v3560_v27 = vld [vmem:[%s5465_s6 + $0x18] sm:$0xff] }
  0x74   :  { %1011 = vmatpush.bf16.msrb.mxu1 %v3547_v4 }
  0x77   :  { %1026 = vmatpush.bf16.msrb.mxu3 %v3554_v33  ;;  %v3557_v33 = vld [vmem:[%s5465_s6] sm:$0xff] }
  0x78   :  { %1012 = vmatpush.bf16.msrb.mxu1 %v3546_v54 }
  0x7b   :  { %1027 = vmatpush.bf16.msrb.mxu3 %v3553_v38 }
  0x7c   :  { %2793 = vmatmul.msk.bf16.vlgmr.msrb.gmra.mxu0 %vm672_vm0, %v4206_v48  ;;  %1013 = vmatpush.bf16.msrb.mxu1 %v3545_v63  ;;  %v3544_v48 = vld [vmem:[%s5462_s4 + $0x18] sm:$0xff]  ;;  %s5485_s4 = sld [smem:[#allocation4_spill]] }
  0x7f   :  { %1028 = vmatpush.bf16.msrb.mxu3 %v3552_v45 }
  0x80   :  { %1014 = vmatpush.bf16.msrb.mxu1 %v3544_v48 }
  0x82   :  { %v3703_v38 = vld [vmem:[%s5485_s4] ss:$0 sm:$0xff] }
  0x83   :  { %1029 = vmatpush.bf16.msrb.mxu3 %v3551_v50  ;;  %v3574_v50 = vld [vmem:[%s5469_s10 + $0x8] sm:$0xff] }
  0x84   :  { %1015 = vmatpush.bf16.msrb.mxu1 %v3543_v37 }
  0x87   :  { %1030 = vmatpush.bf16.msrb.mxu3 %v3550_v53 }
  0x88   :  { %1016 = vmatpush.bf16.msrb.mxu1 %v3542_v44 }
  0x8b   :  { %1031 = vmatpush.bf16.msrb.mxu3 %v3549_v56  ;;  %v3705_v56 = vld [vmem:[%s5467_s9] ss:$0 sm:$0xff] }
  0x8c   :  { %1017 = vmatpush.bf16.msrb.mxu1 %v3541_v12 }
  0x90   :  { %1248 = vmatpush.bf16.msra.mxu1 %v3574_v50 }
  0xa9   :  { %v685_v11 = vpop.f32.mrf.mxu0 }
  0xaa   :  { %v686_v15 = vadd.f32 %v685_v11, %v178_v14 }
  0xac   :  { %v699_v13 = vpop.f32.mrf.mxu1 }
  0xad   :  { %v700_v18 = vadd.f32 %v699_v13, %v686_v15 }
  0xb0   :  { %v713_v60 = vpop.f32.mrf.mxu2 }
  0xb1   :  { %v687_v16 = vpop.f32.mrf.mxu0  ;;  %v727_v19 = vpop.f32.mrf.mxu3  ;;  %v714_v23 = vadd.f32 %v713_v60, %v700_v18 }
  0xb2   :  { %v688_v21 = vadd.f32 %v687_v16, %v178_v14 }
  0xb3   :  { %v728_v28 = vadd.f32 %v727_v19, %v714_v23  ;;  %v3564_v19 = vld [vmem:[%s5465_s6 + $0x38] sm:$0xff]  ;;  %v3562_v23 = vld [vmem:[%s5465_s6 + $0x28] sm:$0xff] }
  0xb4   :  { %v701_v20 = vpop.f32.mrf.mxu1  ;;  %1109 = vmatpush.bf16.msra.mxu0 %v3564_v19 }
  0xb5   :  { %v702_v24 = vadd.f32 %v701_v20, %v688_v21  ;;  %v3572_v20 = vld [vmem:[%s5466_s8 + $0x38] sm:$0xff]  ;;  %v3563_v21 = vld [vmem:[%s5465_s6 + $0x30] sm:$0xff] }
  0xb6   :  { %1191 = vmatpush.bf16.msra.mxu2 %v3572_v20 }
  0xb8   :  { %v715_v17 = vpop.f32.mrf.mxu2  ;;  %1110 = vmatpush.bf16.msra.mxu0 %v3563_v21 }
  0xb9   :  { %v716_v30 = vadd.f32 %v715_v17, %v702_v24  ;;  %v729_v32 = vpop.f32.mrf.mxu3  ;;  %v3570_v24 = vld [vmem:[%s5466_s8 + $0x28] sm:$0xff] }
  0xba   :  { %1192 = vmatpush.bf16.msra.mxu2 %v3571_v22 }
  0xbb   :  { %v730_v34 = vadd.f32 %v729_v32, %v716_v30  ;;  %v3567_v30 = vld [vmem:[%s5466_s8 + $0x10] sm:$0xff]  ;;  %v3566_v32 = vld [vmem:[%s5466_s8 + $0x8] sm:$0xff] }
  0xbc   :  { %1111 = vmatpush.bf16.msra.mxu0 %v3562_v23 }
  0xbe   :  { %1193 = vmatpush.bf16.msra.mxu2 %v3570_v24  ;;  %v1211_v24 = vld [vmem:[%s5473_s1] sm:$0xff] }
  0xc0   :  { %v769_v26 = vpop.f32.mrf.mxu2 }
  0xc8   :  { %v771_v41 = vpop.f32.mrf.mxu2 }
  0xc9   :  { %v741_v25 = vpop.f32.mrf.mxu0 }
  0xca   :  { %v742_v31 = vadd.f32 %v741_v25, %v728_v28  ;;  %v3561_v25 = vld [vmem:[%s5465_s6 + $0x20] sm:$0xff]  ;;  %v3568_v28 = vld [vmem:[%s5466_s8 + $0x18] sm:$0xff] }
  0xcb   :  { %1112 = vmatpush.bf16.msra.mxu0 %v3561_v25  ;;  %v1212_v25 = vld [vmem:[%s5473_s1 + $0x8] sm:$0xff] }
  0xcc   :  { %v755_v29 = vpop.f32.mrf.mxu1 }
  0xcd   :  { %v756_v35 = vadd.f32 %v755_v29, %v742_v31  ;;  %v3559_v29 = vld [vmem:[%s5465_s6 + $0x10] sm:$0xff]  ;;  %v3558_v31 = vld [vmem:[%s5465_s6 + $0x8] sm:$0xff] }
  0xcf   :  { %v770_v42 = vadd.f32 %v769_v26, %v756_v35  ;;  %v3569_v26 = vld [vmem:[%s5466_s8 + $0x20] sm:$0xff]  ;;  %1113 = vmatpush.bf16.msra.mxu0 %v3560_v27 }
  0xd0   :  { %1194 = vmatpush.bf16.msra.mxu2 %v3569_v26 }
  0xd1   :  { %v743_v36 = vpop.f32.mrf.mxu0  ;;  %v872_v47 = vmax.f32 %v770_v42, 0.0  ;;  %v783_v52 = vpop.f32.mrf.mxu3 }
  0xd2   :  { %v744_v39 = vadd.f32 %v743_v36, %v730_v34  ;;  %v784_v62 = vadd.f32 %v783_v52, %v179_v57  ;;  %v3565_v34 = vld [vmem:[%s5466_s8] sm:$0xff] }
  0xd3   :  { %1114 = vmatpush.bf16.msra.mxu0 %v3559_v29  ;;  %v3573_v52 = vld [vmem:[%s5469_s10] sm:$0xff] }
  0xd4   :  { %v757_v40 = vpop.f32.mrf.mxu1  ;;  %v797_v55 = vpop.f32.mrf.mxu2  ;;  %1195 = vmatpush.bf16.msra.mxu2 %v3568_v28  ;;  %1249 = vmatpush.bf16.msra.mxu1 %v3573_v52 }
  0xd5   :  { %v758_v43 = vadd.f32 %v757_v40, %v744_v39  ;;  %v798_v1 = vadd.f32 %v797_v55, %v784_v62  ;;  %v2991_v62 = vld [vmem:[%s5470_s12 + $0x78] sm:$0xf0] }
  0xd7   :  { %v772_v46 = vadd.f32 %v771_v41, %v758_v43  ;;  %1115 = vmatpush.bf16.msra.mxu0 %v3558_v31 }
  0xd8   :  { %1196 = vmatpush.bf16.msra.mxu2 %v3567_v30 }
  0xd9   :  { %v874_v49 = vmax.f32 %v772_v46, 0.0  ;;  %v785_v58 = vpop.f32.mrf.mxu3 }
  0xda   :  { %v786_v2 = vadd.f32 %v785_v58, %v179_v57  ;;  %v2989_v57 = vld [vmem:[%s5470_s12 + $0x70] sm:$0xf]  ;;  %v3590_v58 = vld [vmem:[%s5470_s12 + $0x74] sm:$0xf0] }
  0xdb   :  { %v876_v51 = vpack.c.bf16 %v874_v49, %v872_v47  ;;  %1116 = vmatpush.bf16.msra.mxu0 %v3557_v33  ;;  %v3582_v33 = vld [vmem:[%s5470_s12 + $0x34] sm:$0xf0] }
  0xdc   :  { %v799_v61 = vpop.f32.mrf.mxu2  ;;  %1197 = vmatpush.bf16.msra.mxu2 %v3566_v32  ;;  %v2957_v32 = vld [vmem:[%s5470_s12 + $0x30] sm:$0xf] }
  0xdd   :  { %1018 = vmatmul.bf16.vlgmr.msrb.gmra.mxu1 %v876_v51  ;;  %v800_v7 = vadd.f32 %v799_v61, %v786_v2  ;;  %v3704_v51 = vld [vmem:[%s5464_s7] ss:$0 sm:$0xff]  ;;  %v2990_v61 = vor.u32 %v3590_v58, %v2989_v57  ;;  %v3588_v2 = vld [vmem:[%s5470_s12 + $0x64] sm:$0xf0]  ;;  %v2935_v58 = vld [vmem:[%s5470_s12 + $0x8] sm:$0xf0] }
  0xdf   :  { %1361 = vmatpush.bf16.msra.mxu3 %v2990_v61  ;;  %v3417_v61 = vld [vmem:[%s5474_s14 + $0x348] sm:$0xf] }
  0xe0   :  { %1198 = vmatpush.bf16.msra.mxu2 %v3565_v34  ;;  %v3581_v34 = vld [vmem:[%s5470_s12 + $0x34] sm:$0xf] }
  0xe9   :  { %v811_v59 = vpop.f32.mrf.mxu0 }
  0xea   :  { %v812_v8 = vadd.f32 %v811_v59, %v798_v1  ;;  %v3589_v59 = vld [vmem:[%s5470_s12 + $0x74] sm:$0xf] }
  0xeb   :  { %v2994_v1 = vor.u32 %v3589_v59, %v2991_v62  ;;  %v3699_v62 = vld [vmem:[%s5474_s14 + $0x360] sm:$0xf0] }
  0xec   :  { %v825_v0 = vpop.f32.mrf.mxu1 }
  0xed   :  { %v826_v54 = vadd.f32 %v825_v0, %v812_v8  ;;  %v2981_v0 = vld [vmem:[%s5470_s12 + $0x60] sm:$0xf]  ;;  %1375 = vmatpush.bf16.msrb.mxu0 %v2994_v1  ;;  %v3418_v1 = vor.u32 %v3699_v62, %v3417_v61  ;;  %v3053_v62 = vld [vmem:[%s5474_s14 + $0x70] sm:$0xf] }
  0xef   :  { %2129 = vmatpush.bf16.msrb.mxu2 %v3418_v1  ;;  %v3608_v1 = vld [vmem:[%s5474_s14 + $0x88] sm:$0xf0] }
  0xf1   :  { %v839_v3 = vpop.f32.mrf.mxu3  ;;  %v813_v5 = vpop.f32.mrf.mxu0 }
  0xf2   :  { %v814_v9 = vadd.f32 %v813_v5, %v800_v7  ;;  %v840_v37 = vadd.f32 %v839_v3, %v826_v54  ;;  %v3587_v3 = vld [vmem:[%s5470_s12 + $0x64] sm:$0xf]  ;;  %v2983_v5 = vld [vmem:[%s5470_s12 + $0x68] sm:$0xf0] }
  0xf3   :  { %v2986_v8 = vor.u32 %v3587_v3, %v2983_v5  ;;  %v3389_v3 = vld [vmem:[%s5474_s14 + $0x310] sm:$0xf]  ;;  %v3692_v5 = vld [vmem:[%s5474_s14 + $0x328] sm:$0xf0] }
  0xf4   :  { %v853_v6 = vpop.f32.mrf.mxu2  ;;  %v827_v4 = vpop.f32.mrf.mxu1 }
  0xf5   :  { %v828_v44 = vadd.f32 %v827_v4, %v814_v9  ;;  %v854_v60 = vadd.f32 %v853_v6, %v840_v37  ;;  %v2982_v6 = vor.u32 %v3588_v2, %v2981_v0  ;;  %v2973_v9 = vld [vmem:[%s5470_s12 + $0x50] sm:$0xf]  ;;  %v3586_v4 = vld [vmem:[%s5470_s12 + $0x54] sm:$0xf0]  ;;  %1376 = vmatpush.bf16.msrb.mxu0 %v2986_v8  ;;  %v3696_v0 = vld [vmem:[%s5474_s14 + $0x34c] sm:$0xf] }
  0xf6   :  { %v3419_v2 = vld [vmem:[%s5474_s14 + $0x364] sm:$0xf0]  ;;  %v3391_v8 = vld [vmem:[%s5474_s14 + $0x32c] sm:$0xf0] }
  0xf7   :  { %1362 = vmatpush.bf16.msra.mxu3 %v2982_v6  ;;  %v3422_v6 = vor.u32 %v3696_v0, %v3419_v2  ;;  %v3605_v2 = vld [vmem:[%s5474_s14 + $0x74] sm:$0xf] }
  0xf9   :  { %v841_v63 = vpop.f32.mrf.mxu3  ;;  %v867_v48 = vpop.f32.mrf.mxu0 }
  0xfa   :  { %v842_v10 = vadd.f32 %v841_v63, %v828_v44  ;;  %v868_v12 = vadd.f32 %v867_v48, %v854_v60  ;;  %v3585_v63 = vld [vmem:[%s5470_s12 + $0x54] sm:$0xf]  ;;  %v2975_v48 = vld [vmem:[%s5470_s12 + $0x58] sm:$0xf0] }
  0xfb   :  { %v2978_v60 = vor.u32 %v3585_v63, %v2975_v48  ;;  %v3640_v63 = vld [vmem:[%s5474_s14 + $0x18c] sm:$0xf]  ;;  %v3195_v48 = vld [vmem:[%s5474_s14 + $0x1a4] sm:$0xf0] }
  0xfc   :  { %v855_v11 = vpop.f32.mrf.mxu2  ;;  %v873_v16 = vmax.f32 %v868_v12, 0.0  ;;  %v2965_v12 = vld [vmem:[%s5470_s12 + $0x40] sm:$0xf] }
  0xfd   :  { %v856_v13 = vadd.f32 %v855_v11, %v842_v10  ;;  %v2974_v11 = vor.u32 %v3586_v4, %v2973_v9  ;;  %1377 = vmatpush.bf16.msrb.mxu0 %v2978_v60  ;;  %v3193_v9 = vld [vmem:[%s5474_s14 + $0x188] sm:$0xf]  ;;  %v3390_v4 = vor.u32 %v3692_v5, %v3389_v3  ;;  %v3685_v60 = vld [vmem:[%s5474_s14 + $0x2f0] sm:$0xf0]  ;;  %v3055_v3 = vld [vmem:[%s5474_s14 + $0x8c] sm:$0xf0] }
  0xfe   :  { %v3706_v5 = vld [vmem:[%s5468_s11] ss:$0 sm:$0xff] }
  0xff   :  { %1363 = vmatpush.bf16.msra.mxu3 %v2974_v11  ;;  %v3361_v11 = vld [vmem:[%s5474_s14 + $0x2d8] sm:$0xf]  ;;  %2130 = vmatpush.bf16.msrb.mxu2 %v3390_v4 }
 0x100   :  { %v3251_v4 = vld [vmem:[%s5474_s14 + $0x214] sm:$0xf0] }
 0x101   :  { %v869_v14 = vpop.f32.mrf.mxu0 }
 0x102   :  { %v870_v15 = vadd.f32 %v869_v14, %v856_v13  ;;  %v3584_v13 = vld [vmem:[%s5470_s12 + $0x44] sm:$0xf0]  ;;  %v3583_v14 = vld [vmem:[%s5470_s12 + $0x44] sm:$0xf] }
 0x104   :  { %v875_v17 = vmax.f32 %v870_v15, 0.0  ;;  %v2967_v15 = vld [vmem:[%s5470_s12 + $0x48] sm:$0xf0] }
 0x105   :  { %v2970_v19 = vor.u32 %v3583_v14, %v2967_v15  ;;  %v3165_v14 = vld [vmem:[%s5474_s14 + $0x150] sm:$0xf]  ;;  %v3636_v15 = vld [vmem:[%s5474_s14 + $0x168] sm:$0xf0] }
 0x106   :  { %v877_v18 = vpack.c.bf16 %v875_v17, %v873_v16  ;;  %v2966_v17 = vor.u32 %v3584_v13, %v2965_v12  ;;  %v3682_v12 = vld [vmem:[%s5474_s14 + $0x2dc] sm:$0xf]  ;;  %v3363_v13 = vld [vmem:[%s5474_s14 + $0x2f4] sm:$0xf0] }
 0x107   :  { %1378 = vmatpush.bf16.msrb.mxu0 %v2970_v19  ;;  %v3362_v19 = vor.u32 %v3685_v60, %v3361_v11  ;;  %v3027_v11 = vld [vmem:[%s5474_s14 + $0x54] sm:$0xf0] }
 0x108   :  { %1032 = vmatmul.bf16.vlgmr.msrb.gmra.mxu3 %v877_v18 }
 0x109   :  { %1364 = vmatpush.bf16.msra.mxu3 %v2966_v17  ;;  %v3633_v17 = vld [vmem:[%s5474_s14 + $0x154] sm:$0xf]  ;;  %2131 = vmatpush.bf16.msrb.mxu2 %v3362_v19  ;;  %v3700_v19 = vld [vmem:[%s5474_s14 + $0x368] sm:$0xf0] }
 0x15a   :  { %v1019_v35 = vpop.f32.mrf.mxu1 }
 0x15b   :  { %v1020_v40 = vadd.f32 %v3703_v38, %v1019_v35  ;;  %v2958_v35 = vor.u32 %v3582_v33, %v2957_v32  ;;  %v3109_v32 = vld [vmem:[%s5474_s14 + $0xe0] sm:$0xf] }
 0x15d   :  { %1365 = vmatpush.bf16.msra.mxu3 %v2958_v35  ;;  %v3619_v35 = vld [vmem:[%s5474_s14 + $0xe4] sm:$0xf] }
 0x162   :  { %v1021_v39 = vpop.f32.mrf.mxu1 }
 0x163   :  { %v1022_v41 = vadd.f32 %v3703_v38, %v1021_v39  ;;  %v2949_v39 = vld [vmem:[%s5470_s12 + $0x20] sm:$0xf] }
 0x18b   :  { %v1033_v36 = vpop.f32.mrf.mxu3 }
 0x18c   :  { %v1034_v42 = vadd.f32 %v1033_v36, %v1020_v40  ;;  %v2959_v36 = vld [vmem:[%s5470_s12 + $0x38] sm:$0xf0]  ;;  %v3580_v40 = vld [vmem:[%s5470_s12 + $0x24] sm:$0xf0] }
 0x18d   :  { %v2962_v38 = vor.u32 %v3581_v34, %v2959_v36  ;;  %v3622_v34 = vld [vmem:[%s5474_s14 + $0xf8] sm:$0xf0]  ;;  %v3111_v36 = vld [vmem:[%s5474_s14 + $0xfc] sm:$0xf0] }
 0x18e   :  { %v1038_v46 = vmax.f32 %v1034_v42, 0.0  ;;  %v2950_v42 = vor.u32 %v3580_v40, %v2949_v39  ;;  %v3305_v39 = vld [vmem:[%s5474_s14 + $0x268] sm:$0xf]  ;;  %v3671_v40 = vld [vmem:[%s5474_s14 + $0x280] sm:$0xf0] }
 0x18f   :  { %1379 = vmatpush.bf16.msrb.mxu0 %v2962_v38 }
 0x190   :  { %1366 = vmatpush.bf16.msra.mxu3 %v2950_v42  ;;  %v3307_v42 = vld [vmem:[%s5474_s14 + $0x284] sm:$0xf0] }
 0x193   :  { %v1035_v43 = vpop.f32.mrf.mxu3 }
 0x194   :  { %v1036_v45 = vadd.f32 %v1035_v43, %v1022_v41  ;;  %v3579_v41 = vld [vmem:[%s5470_s12 + $0x24] sm:$0xf]  ;;  %v2951_v43 = vld [vmem:[%s5470_s12 + $0x28] sm:$0xf0] }
 0x196   :  { %v1039_v47 = vmax.f32 %v1036_v45, 0.0  ;;  %v2954_v45 = vor.u32 %v3579_v41, %v2951_v43  ;;  %v3668_v41 = vld [vmem:[%s5474_s14 + $0x26c] sm:$0xf]  ;;  %v3110_v43 = vor.u32 %v3622_v34, %v3109_v32  ;;  %v3201_v32 = vld [vmem:[%s5474_s14 + $0x190] sm:$0xf] }
 0x198   :  { %v1040_v49 = vpack.c.bf16 %v1039_v47, %v1038_v46  ;;  %1380 = vmatpush.bf16.msrb.mxu0 %v2954_v45  ;;  %v2941_v46 = vld [vmem:[%s5470_s12 + $0x10] sm:$0xf]  ;;  %v3578_v47 = vld [vmem:[%s5470_s12 + $0x14] sm:$0xf0]  ;;  %v3114_v45 = vor.u32 %v3619_v35, %v3111_v36  ;;  %v3641_v36 = vld [vmem:[%s5474_s14 + $0x194] sm:$0xf] }
 0x199   :  { %v2942_v50 = vor.u32 %v3578_v47, %v2941_v46  ;;  %v3081_v46 = vld [vmem:[%s5474_s14 + $0xa8] sm:$0xf]  ;;  %v3306_v47 = vor.u32 %v3671_v40, %v3305_v39 }
 0x19a   :  { %1117 = vmatmul.bf16.vlgmr.msra.gmra.mxu0 %v1040_v49  ;;  %1199 = vmatmul.bf16.vlgmr.msra.gmra.mxu2 %v1040_v49  ;;  %v3577_v49 = vld [vmem:[%s5470_s12 + $0x14] sm:$0xf] }
 0x19b   :  { %1367 = vmatpush.bf16.msra.mxu3 %v2942_v50  ;;  %v3612_v50 = vld [vmem:[%s5474_s14 + $0xac] sm:$0xf] }
 0x217   :  { %v1118_v53 = vpop.f32.mrf.mxu0 }
 0x218   :  { %v1119_v55 = vadd.f32 %v3704_v51, %v1118_v53  ;;  %v2933_v53 = vld [vmem:[%s5470_s12] sm:$0xf] }
 0x21a   :  { %2384 = vst.msk [vmem:[%s5471_s17] sm:$0xff] %vm1238_vm1, %v1119_v55 }
 0x21d   :  { %v1200_v7 = vpop.f32.mrf.mxu2 }
 0x21e   :  { %v1201_v54 = vadd.f32 %v3705_v56, %v1200_v7  ;;  %v3689_v7 = vld [vmem:[%s5474_s14 + $0x314] sm:$0xf] }
 0x21f   :  { %v1120_v37 = vpop.f32.mrf.mxu0 }
 0x220   :  { %v1205_v44 = vmul.f32 0.5, %v1201_v54  ;;  %2386 = vst.msk [vmem:[%s5472_s18] sm:$0xff] %vm1238_vm1, %v1201_v54  ;;  %v1121_v10 = vadd.f32 %v3704_v51, %v1120_v37  ;;  %v2943_v51 = vld [vmem:[%s5470_s12 + $0x18] sm:$0xf0]  ;;  %v3643_v54 = vld [vmem:[%s5474_s14 + $0x1a0] sm:$0xf0]  ;;  %v3394_v37 = vor.u32 %v3689_v7, %v3391_v8 }
 0x221   :  { %v2946_v52 = vor.u32 %v3577_v49, %v2943_v51  ;;  %v3615_v49 = vld [vmem:[%s5474_s14 + $0xc0] sm:$0xf0]  ;;  %v3083_v51 = vld [vmem:[%s5474_s14 + $0xc4] sm:$0xf0]  ;;  %v3249_v7 = vld [vmem:[%s5474_s14 + $0x1f8] sm:$0xf] }
 0x222   :  { %2385 = vst.msk [vmem:[%s5471_s17 + $0x8] sm:$0xff] %vm1238_vm1, %v1121_v10  ;;  %v1207_v16 = vmul.f32 1.442695, %v1205_v44  ;;  %v3194_v44 = vor.u32 %v3643_v54, %v3193_v9  ;;  %v3086_v61 = vor.u32 %v3612_v50, %v3083_v51  ;;  %v3657_v8 = vld [vmem:[%s5474_s14 + $0x210] sm:$0xf0]  ;;  %v3054_v54 = vor.u32 %v3608_v1, %v3053_v62 }
 0x223   :  { %1381 = vmatpush.bf16.msrb.mxu0 %v2946_v52  ;;  %v3310_v52 = vor.u32 %v3668_v41, %v3307_v42  ;;  %v3654_v9 = vld [vmem:[%s5474_s14 + $0x1fc] sm:$0xf]  ;;  %v3397_v41 = vld [vmem:[%s5474_s14 + $0x318] sm:$0xf]  ;;  %v3693_v42 = vld [vmem:[%s5474_s14 + $0x330] sm:$0xf0] }
 0x224   :  { %3707 = vpow2.f32 %v1207_v16  ;;  %2115 = vmatpush.bf16.msrb.mxu1 %v3194_v44  ;;  %v3166_v16 = vor.u32 %v3636_v15, %v3165_v14  ;;  %v3601_v44 = vld [vmem:[%s5474_s14 + $0x50] sm:$0xf0]  ;;  %v3650_v14 = vld [vmem:[%s5474_s14 + $0x1d8] sm:$0xf0]  ;;  %v3647_v15 = vld [vmem:[%s5474_s14 + $0x1c4] sm:$0xf] }
 0x225   :  { %v1202_v18 = vpop.f32.mrf.mxu2  ;;  %v3173_v51 = vld [vmem:[%s5474_s14 + $0x158] sm:$0xf]  ;;  %v3371_v62 = vld [vmem:[%s5474_s14 + $0x2fc] sm:$0xf0] }
 0x226   :  { %v1203_v20 = vadd.f32 %v3705_v56, %v1202_v18  ;;  %v3575_v56 = vld [vmem:[%s5470_s12 + $0x4] sm:$0xf]  ;;  %v3167_v18 = vld [vmem:[%s5474_s14 + $0x16c] sm:$0xf0] }
 0x227   :  { %v2938_v59 = vor.u32 %v3575_v56, %v2935_v58  ;;  %v3279_v58 = vld [vmem:[%s5474_s14 + $0x24c] sm:$0xf0] }
 0x228   :  { %v1206_v21 = vmul.f32 0.5, %v1203_v20  ;;  %2387 = vst.msk [vmem:[%s5472_s18 + $0x8] sm:$0xff] %vm1238_vm1, %v1203_v20  ;;  %v3170_v20 = vor.u32 %v3633_v17, %v3167_v18  ;;  %2116 = vmatpush.bf16.msrb.mxu1 %v3166_v16  ;;  %v3223_v17 = vld [vmem:[%s5474_s14 + $0x1dc] sm:$0xf0]  ;;  %v3425_v18 = vld [vmem:[%s5474_s14 + $0x350] sm:$0xf] }
 0x229   :  { %1382 = vmatpush.bf16.msrb.mxu0 %v2938_v59  ;;  %v3082_v59 = vor.u32 %v3615_v49, %v3081_v46  ;;  %v3226_v34 = vor.u32 %v3647_v15, %v3223_v17  ;;  %v3426_v35 = vor.u32 %v3700_v19, %v3425_v18  ;;  %v3399_v46 = vld [vmem:[%s5474_s14 + $0x334] sm:$0xf0]  ;;  %v3623_v17 = vld [vmem:[%s5474_s14 + $0x100] sm:$0xf0]  ;;  %v3620_v19 = vld [vmem:[%s5474_s14 + $0xec] sm:$0xf] }
 0x22a   :  { %v1209_v22 = vmul.f32 1.442695, %v1206_v21  ;;  %v3708_v23 = vpop.eup %3707  ;;  %v3333_v21 = vld [vmem:[%s5474_s14 + $0x2a0] sm:$0xf] }
 0x22b   :  { %v1213_v26 = vmul.f32 %v3708_v23, %v1211_v24  ;;  %v3366_v23 = vor.u32 %v3682_v12, %v3363_v13  ;;  %v3137_v24 = vld [vmem:[%s5474_s14 + $0x118] sm:$0xf]  ;;  %v3254_v12 = vor.u32 %v3654_v9, %v3251_v4  ;;  %v3221_v13 = vld [vmem:[%s5474_s14 + $0x1c0] sm:$0xf] }
 0x22c   :  { %3709 = vpow2.f32 %v1209_v22  ;;  %v3678_v22 = vld [vmem:[%s5474_s14 + $0x2b8] sm:$0xf0] }
 0x22d   :  { %v1215_v29 = vadd.f32 %v1213_v26, %v1119_v55  ;;  %v3576_v55 = vld [vmem:[%s5470_s12 + $0x4] sm:$0xf0]  ;;  %2157 = vmatpush.bf16.msra.mxu0 %v3422_v6  ;;  %v3626_v26 = vld [vmem:[%s5474_s14 + $0x11c] sm:$0xf]  ;;  %v3334_v33 = vor.u32 %v3678_v22, %v3333_v21  ;;  %v3697_v22 = vld [vmem:[%s5474_s14 + $0x354] sm:$0xf] }
 0x22e   :  { %v2934_v57 = vor.u32 %v3576_v55, %v2933_v53  ;;  %v3277_v53 = vld [vmem:[%s5474_s14 + $0x230] sm:$0xf]  ;;  %v3664_v55 = vld [vmem:[%s5474_s14 + $0x248] sm:$0xf0] }
 0x22f   :  { %2132 = vmatpush.bf16.msrb.mxu2 %v3334_v33  ;;  %v3278_v0 = vor.u32 %v3664_v55, %v3277_v53  ;;  %v3644_v33 = vld [vmem:[%s5474_s14 + $0x1a8] sm:$0xf0]  ;;  %v3398_v53 = vor.u32 %v3693_v42, %v3397_v41  ;;  %v3634_v55 = vld [vmem:[%s5474_s14 + $0x15c] sm:$0xf]  ;;  %v3061_v41 = vld [vmem:[%s5474_s14 + $0x78] sm:$0xf] }
 0x230   :  { %1368 = vmatpush.bf16.msra.mxu3 %v2934_v57  ;;  %v3661_v57 = vld [vmem:[%s5474_s14 + $0x234] sm:$0xf]  ;;  %v3202_v49 = vor.u32 %v3644_v33, %v3201_v32  ;;  %v3091_v32 = vld [vmem:[%s5474_s14 + $0xcc] sm:$0xf0] }
 0x231   :  { %2158 = vmatpush.bf16.msra.mxu0 %v3394_v37  ;;  %v3282_v6 = vor.u32 %v3661_v57, %v3279_v58  ;;  %v3250_v37 = vor.u32 %v3657_v8, %v3249_v7  ;;  %v3369_v58 = vld [vmem:[%s5474_s14 + $0x2e0] sm:$0xf]  ;;  %v3676_v7 = vld [vmem:[%s5474_s14 + $0x2ac] sm:$0xf]  ;;  %v3343_v8 = vld [vmem:[%s5474_s14 + $0x2c4] sm:$0xf0] }
 0x232   :  { %v3710_v27 = vpop.eup %3709  ;;  %v3346_v4 = vor.u32 %v3676_v7, %v3343_v8  ;;  %v3609_v42 = vld [vmem:[%s5474_s14 + $0x90] sm:$0xf0]  ;;  %v1275_v7 = vld [vmem:[%s5475_s13] sm:$0x3] }
 0x233   :  { %v1214_v28 = vmul.f32 %v3710_v27, %v1212_v25  ;;  %v3629_v25 = vld [vmem:[%s5474_s14 + $0x130] sm:$0xf0]  ;;  %v3675_v27 = vld [vmem:[%s5474_s14 + $0x2a4] sm:$0xf]  ;;  %2133 = vmatpush.bf16.msrb.mxu2 %v3306_v47 }
 0x235   :  { %v1216_v30 = vadd.f32 %v1214_v28, %v1121_v10  ;;  %v3198_v10 = vor.u32 %v3640_v63, %v3195_v48  ;;  %v3335_v28 = vld [vmem:[%s5474_s14 + $0x2bc] sm:$0xf0]  ;;  %2159 = vmatpush.bf16.msra.mxu0 %v3366_v23  ;;  %v3058_v63 = vor.u32 %v3605_v2, %v3055_v3  ;;  %v3025_v48 = vld [vmem:[%s5474_s14 + $0x38] sm:$0xf]  ;;  %v3427_v23 = vld [vmem:[%s5474_s14 + $0x36c] sm:$0xf0] }
 0x236   :  { %v3338_v38 = vor.u32 %v3675_v27, %v3335_v28  ;;  %v3026_v21 = vor.u32 %v3601_v44, %v3025_v48  ;;  %v3594_v27 = vld [vmem:[%s5474_s14 + $0x18] sm:$0xf0]  ;;  %v3591_v28 = vld [vmem:[%s5474_s14 + $0x4] sm:$0xf]  ;;  %v3430_v40 = vor.u32 %v3697_v22, %v3427_v23  ;;  %v3147_v44 = vld [vmem:[%s5474_s14 + $0x13c] sm:$0xf0] }
 0x237   :  { %v1217_v31 = vpack.c.bf16 %v1216_v30, %v1215_v29  ;;  %2143 = vmatpush.bf16.msrb.mxu3 %v3198_v10  ;;  %v3139_v29 = vld [vmem:[%s5474_s14 + $0x134] sm:$0xf0]  ;;  %v3138_v30 = vor.u32 %v3629_v25, %v3137_v24  ;;  %2134 = vmatpush.bf16.msrb.mxu2 %v3278_v0  ;;  %v3598_v10 = vld [vmem:[%s5474_s14 + $0x3c] sm:$0xf]  ;;  %v2997_v25 = vld [vmem:[%s5474_s14] sm:$0xf] }
 0x238   :  { %v3030_v24 = vor.u32 %v3598_v10, %v3027_v11  ;;  %v3313_v11 = vld [vmem:[%s5474_s14 + $0x270] sm:$0xf]  ;;  %v3285_v22 = vld [vmem:[%s5474_s14 + $0x238] sm:$0xf]  ;;  %v3665_v23 = vld [vmem:[%s5474_s14 + $0x250] sm:$0xf0] }
 0x239   :  { %2930 = vmatmul.msk.bf16.vlgmr.msra.gmra.mxu1 %vm1238_vm1, %v1217_v31  ;;  %v3142_v31 = vor.u32 %v3626_v26, %v3139_v29  ;;  %2160 = vmatpush.bf16.msra.mxu0 %v3338_v38  ;;  %v3222_v26 = vor.u32 %v3650_v14, %v3221_v13  ;;  %v2999_v29 = vld [vmem:[%s5474_s14 + $0x1c] sm:$0xf0]  ;;  %v3203_v38 = vld [vmem:[%s5474_s14 + $0x1ac] sm:$0xf0]  ;;  %v3669_v13 = vld [vmem:[%s5474_s14 + $0x274] sm:$0xf] }
 0x23a   :  { %2117 = vmatpush.bf16.msrb.mxu1 %v3138_v30  ;;  %v3002_v47 = vor.u32 %v3591_v28, %v2999_v29  ;;  %v3206_v50 = vor.u32 %v3641_v36, %v3203_v38  ;;  %v3315_v14 = vld [vmem:[%s5474_s14 + $0x28c] sm:$0xf0]  ;;  %v3616_v29 = vld [vmem:[%s5474_s14 + $0xc8] sm:$0xf0]  ;;  %v3655_v38 = vld [vmem:[%s5474_s14 + $0x204] sm:$0xf] }
 0x23b   :  { %2144 = vmatpush.bf16.msrb.mxu3 %v3170_v20  ;;  %2135 = vmatpush.bf16.msrb.mxu2 %v3250_v37  ;;  %v3627_v37 = vld [vmem:[%s5474_s14 + $0x124] sm:$0xf]  ;;  %v3318_v15 = vor.u32 %v3669_v13, %v3315_v14  ;;  %v3089_v28 = vld [vmem:[%s5474_s14 + $0xb0] sm:$0xf] }
 0x23c   :  { %v3150_v10 = vor.u32 %v3627_v37, %v3147_v44  ;;  %v3433_v37 = vld [vmem:[%s5474_s14 + $0x358] sm:$0xf] }
 0x23d   :  { %2161 = vmatpush.bf16.msra.mxu0 %v3310_v52  ;;  %v3637_v52 = vld [vmem:[%s5474_s14 + $0x170] sm:$0xf0] }
 0x23e   :  { %2118 = vmatpush.bf16.msrb.mxu1 %v3110_v43  ;;  %v2998_v43 = vor.u32 %v3594_v27, %v2997_v25  ;;  %v3174_v0 = vor.u32 %v3637_v52, %v3173_v51  ;;  %v3662_v25 = vld [vmem:[%s5474_s14 + $0x23c] sm:$0xf]  ;;  %v3648_v52 = vld [vmem:[%s5474_s14 + $0x1cc] sm:$0xf] }
 0x23f   :  { %2145 = vmatpush.bf16.msrb.mxu3 %v3142_v31  ;;  %2136 = vmatpush.bf16.msrb.mxu2 %v3222_v26  ;;  %v3287_v26 = vld [vmem:[%s5474_s14 + $0x254] sm:$0xf0] }
 0x240   :  { %v3290_v27 = vor.u32 %v3662_v25, %v3287_v26  ;;  %v3645_v25 = vld [vmem:[%s5474_s14 + $0x1b0] sm:$0xf0]  ;;  %v3642_v26 = vld [vmem:[%s5474_s14 + $0x19c] sm:$0xf] }
 0x241   :  { %2162 = vmatpush.bf16.msra.mxu0 %v3282_v6  ;;  %v3679_v6 = vld [vmem:[%s5474_s14 + $0x2c0] sm:$0xf0] }
 0x242   :  { %2119 = vmatpush.bf16.msrb.mxu1 %v3082_v59  ;;  %v3686_v59 = vld [vmem:[%s5474_s14 + $0x2f8] sm:$0xf0] }
 0x243   :  { %2146 = vmatpush.bf16.msrb.mxu3 %v3114_v45  ;;  %v3690_v45 = vld [vmem:[%s5474_s14 + $0x31c] sm:$0xf]  ;;  %2185 = vmatpush.bf16.msra.mxu2 %v3426_v35  ;;  %v3370_v2 = vor.u32 %v3686_v59, %v3369_v58  ;;  %v3599_v59 = vld [vmem:[%s5474_s14 + $0x44] sm:$0xf] }
 0x244   :  { %v3402_v57 = vor.u32 %v3690_v45, %v3399_v46  ;;  %v3658_v35 = vld [vmem:[%s5474_s14 + $0x218] sm:$0xf0]  ;;  %v3063_v46 = vld [vmem:[%s5474_s14 + $0x94] sm:$0xf0] }
 0x245   :  { %2163 = vmatpush.bf16.msra.mxu0 %v3254_v12  ;;  %v3606_v45 = vld [vmem:[%s5474_s14 + $0x7c] sm:$0xf] }
 0x246   :  { %2120 = vmatpush.bf16.msrb.mxu1 %v3054_v54  ;;  %v3145_v54 = vld [vmem:[%s5474_s14 + $0x120] sm:$0xf] }
 0x247   :  { %2147 = vmatpush.bf16.msrb.mxu3 %v3086_v61  ;;  %v3683_v61 = vld [vmem:[%s5474_s14 + $0x2e4] sm:$0xf]  ;;  %2186 = vmatpush.bf16.msra.mxu2 %v3398_v53  ;;  %v3231_v53 = vld [vmem:[%s5474_s14 + $0x1e4] sm:$0xf0] }
 0x248   :  { %v3374_v3 = vor.u32 %v3683_v61, %v3371_v62  ;;  %v3035_v61 = vld [vmem:[%s5474_s14 + $0x5c] sm:$0xf0] }
 0x249   :  { %2164 = vmatpush.bf16.msra.mxu0 %v3226_v34  ;;  %v3257_v34 = vld [vmem:[%s5474_s14 + $0x200] sm:$0xf]  ;;  %v3038_v62 = vor.u32 %v3599_v59, %v3035_v61 }
 0x24a   :  { %2121 = vmatpush.bf16.msrb.mxu1 %v3026_v21  ;;  %v3258_v36 = vor.u32 %v3658_v35, %v3257_v34  ;;  %v3684_v34 = vld [vmem:[%s5474_s14 + $0x2ec] sm:$0xf]  ;;  %v3379_v35 = vld [vmem:[%s5474_s14 + $0x304] sm:$0xf0] }
 0x24b   :  { %2148 = vmatpush.bf16.msrb.mxu3 %v3058_v63  ;;  %2187 = vmatpush.bf16.msra.mxu2 %v3370_v2  ;;  %v3630_v63 = vld [vmem:[%s5474_s14 + $0x138] sm:$0xf0] }
 0x24c   :  { %v3146_v48 = vor.u32 %v3630_v63, %v3145_v54  ;;  %v1277_v63 = vperm.slane %v1275_v7, 0 }
 0x24e   :  { %2122 = vmatpush.bf16.msrb.mxu1 %v2998_v43  ;;  %v3062_v43 = vor.u32 %v3609_v42, %v3061_v41  ;;  %v3638_v41 = vld [vmem:[%s5474_s14 + $0x178] sm:$0xf0]  ;;  %v3635_v42 = vld [vmem:[%s5474_s14 + $0x164] sm:$0xf] }
 0x24f   :  { %2149 = vmatpush.bf16.msrb.mxu3 %v3030_v24  ;;  %v3286_v24 = vor.u32 %v3665_v23, %v3285_v22  ;;  %v3209_v23 = vld [vmem:[%s5474_s14 + $0x198] sm:$0xf] }
 0x252   :  { %2171 = vmatpush.bf16.msra.mxu1 %v3202_v49  ;;  %v3229_v49 = vld [vmem:[%s5474_s14 + $0x1c8] sm:$0xf] }
 0x253   :  { %2150 = vmatpush.bf16.msrb.mxu3 %v3002_v47  ;;  %v3066_v47 = vor.u32 %v3606_v45, %v3063_v46  ;;  %v3382_v46 = vor.u32 %v3684_v34, %v3379_v35 }
 0x256   :  { %2172 = vmatpush.bf16.msra.mxu1 %v3174_v0  ;;  %v3005_v0 = vld [vmem:[%s5474_s14 + $0x8] sm:$0xf] }
 0x25a   :  { %2173 = vmatpush.bf16.msra.mxu1 %v3146_v48 }
 0x2b6   :  { %v1251_v56 = vpop.f32.mrf.mxu1 }
 0x2b7   :  { %v1252_v60 = vadd.f32 %v3706_v5, %v1251_v56  ;;  %v3175_v56 = vld [vmem:[%s5474_s14 + $0x174] sm:$0xf0] }
 0x2b8   :  { %v3178_v1 = vor.u32 %v3634_v55, %v3175_v56  ;;  %v3234_v55 = vor.u32 %v3648_v52, %v3231_v53  ;;  %v3033_v56 = vld [vmem:[%s5474_s14 + $0x40] sm:$0xf] }
 0x2b9   :  { %v1256_v30 = vmax.f32 %v1252_v60, 0.0  ;;  %v3672_v60 = vld [vmem:[%s5474_s14 + $0x288] sm:$0xf0] }
 0x2ba   :  { %v3314_v12 = vor.u32 %v3672_v60, %v3313_v11  ;;  %v3698_v11 = vld [vmem:[%s5474_s14 + $0x35c] sm:$0xf]  ;;  %v3435_v60 = vld [vmem:[%s5474_s14 + $0x374] sm:$0xf0] }
 0x2be   :  { %v1253_v16 = vpop.f32.mrf.mxu1 }
 0x2bf   :  { %v1254_v20 = vadd.f32 %v3706_v5, %v1253_v16  ;;  %v3341_v5 = vld [vmem:[%s5474_s14 + $0x2a8] sm:$0xf] }
 0x2c0   :  { %v3342_v9 = vor.u32 %v3679_v6, %v3341_v5  ;;  %v3117_v16 = vld [vmem:[%s5474_s14 + $0xe8] sm:$0xf] }
 0x2c1   :  { %v1257_v31 = vmax.f32 %v1254_v20, 0.0  ;;  %v3118_v18 = vor.u32 %v3623_v17, %v3117_v16  ;;  %v3119_v20 = vld [vmem:[%s5474_s14 + $0x104] sm:$0xf0]  ;;  %v3405_v16 = vld [vmem:[%s5474_s14 + $0x320] sm:$0xf] }
 0x2c2   :  { %2188 = vmatpush.bf16.msra.mxu2 %v3342_v9  ;;  %v3122_v21 = vor.u32 %v3620_v19, %v3119_v20  ;;  %v3007_v5 = vld [vmem:[%s5474_s14 + $0x24] sm:$0xf0]  ;;  %v1278_v9 = vperm.slane %v1275_v7, 1  ;;  %v3694_v19 = vld [vmem:[%s5474_s14 + $0x338] sm:$0xf0] }
 0x2c3   :  { %v1258_v39 = vpack.c.bf16 %v1257_v31, %v1256_v30  ;;  %2174 = vmatpush.bf16.msra.mxu1 %v3118_v18  ;;  %v3090_v30 = vor.u32 %v3616_v29, %v3089_v28  ;;  %v3613_v31 = vld [vmem:[%s5474_s14 + $0xb4] sm:$0xf]  ;;  %v3691_v20 = vld [vmem:[%s5474_s14 + $0x324] sm:$0xf]  ;;  %v3406_v28 = vor.u32 %v3694_v19, %v3405_v16  ;;  %v3624_v7 = vld [vmem:[%s5474_s14 + $0x108] sm:$0xf0] }
 0x2c4   :  { %v3094_v33 = vor.u32 %v3613_v31, %v3091_v32  ;;  %v3687_v31 = vld [vmem:[%s5474_s14 + $0x300] sm:$0xf0] }
 0x2c5   :  { %1369 = vmatmul.bf16.vlgmr.msra.gmra.mxu3 %v1258_v39  ;;  %1383 = vmatmul.bf16.vlgmr.msrb.gmra.mxu0 %v1258_v39  ;;  %v3259_v39 = vld [vmem:[%s5474_s14 + $0x21c] sm:$0xf0]  ;;  %v3659_v19 = vld [vmem:[%s5474_s14 + $0x220] sm:$0xf0] }
 0x2c6   :  { %2213 = vmatpush.bf16.msrb.mxu0 %v3430_v40  ;;  %2199 = vmatpush.bf16.msra.mxu3 %v3206_v50  ;;  %v3262_v40 = vor.u32 %v3655_v38, %v3259_v39  ;;  %v3651_v50 = vld [vmem:[%s5474_s14 + $0x1e0] sm:$0xf0]  ;;  %v3181_v39 = vld [vmem:[%s5474_s14 + $0x160] sm:$0xf] }
 0x2c7   :  { %2189 = vmatpush.bf16.msra.mxu2 %v3314_v12  ;;  %2175 = vmatpush.bf16.msra.mxu1 %v3090_v30  ;;  %v3230_v51 = vor.u32 %v3651_v50, %v3229_v49  ;;  %v3377_v30 = vld [vmem:[%s5474_s14 + $0x2e8] sm:$0xf]  ;;  %v3680_v49 = vld [vmem:[%s5474_s14 + $0x2c8] sm:$0xf0]  ;;  %v3677_v50 = vld [vmem:[%s5474_s14 + $0x2b4] sm:$0xf]  ;;  %v3182_v52 = vor.u32 %v3638_v41, %v3181_v39 }
 0x2c8   :  { %v3378_v45 = vor.u32 %v3687_v31, %v3377_v30  ;;  %v3237_v30 = vld [vmem:[%s5474_s14 + $0x1d0] sm:$0xf]  ;;  %v3652_v31 = vld [vmem:[%s5474_s14 + $0x1e8] sm:$0xf0]  ;;  %v3041_v39 = vld [vmem:[%s5474_s14 + $0x48] sm:$0xf] }
 0x2c9   :  { %v3603_v41 = vld [vmem:[%s5474_s14 + $0x60] sm:$0xf0] }
 0x2ca   :  { %2214 = vmatpush.bf16.msrb.mxu0 %v3402_v57  ;;  %2200 = vmatpush.bf16.msra.mxu3 %v3178_v1  ;;  %v3602_v57 = vld [vmem:[%s5474_s14 + $0x58] sm:$0xf0]  ;;  %v3595_v1 = vld [vmem:[%s5474_s14 + $0x20] sm:$0xf0] }
 0x2cb   :  { %2190 = vmatpush.bf16.msra.mxu2 %v3286_v24  ;;  %2176 = vmatpush.bf16.msra.mxu1 %v3062_v43  ;;  %v3034_v58 = vor.u32 %v3602_v57, %v3033_v56  ;;  %v3006_v2 = vor.u32 %v3595_v1, %v3005_v0  ;;  %v3183_v43 = vld [vmem:[%s5474_s14 + $0x17c] sm:$0xf0]  ;;  %v3631_v56 = vld [vmem:[%s5474_s14 + $0x140] sm:$0xf0]  ;;  %v3628_v57 = vld [vmem:[%s5474_s14 + $0x12c] sm:$0xf] }
 0x2cc   :  { %v3186_v53 = vor.u32 %v3635_v42, %v3183_v43  ;;  %v3673_v0 = vld [vmem:[%s5474_s14 + $0x290] sm:$0xf0]  ;;  %v3670_v1 = vld [vmem:[%s5474_s14 + $0x27c] sm:$0xf]  ;;  %v3600_v42 = vld [vmem:[%s5474_s14 + $0x4c] sm:$0xf] }
 0x2cd   :  { %v3043_v43 = vld [vmem:[%s5474_s14 + $0x64] sm:$0xf0] }
 0x2ce   :  { %2215 = vmatpush.bf16.msrb.mxu0 %v3374_v3  ;;  %2201 = vmatpush.bf16.msra.mxu3 %v3150_v10  ;;  %v3592_v3 = vld [vmem:[%s5474_s14 + $0xc] sm:$0xf]  ;;  %v3701_v10 = vld [vmem:[%s5474_s14 + $0x370] sm:$0xf0] }
 0x2cf   :  { %2191 = vmatpush.bf16.msra.mxu2 %v3258_v36  ;;  %2177 = vmatpush.bf16.msra.mxu1 %v3034_v58  ;;  %v3010_v6 = vor.u32 %v3592_v3, %v3007_v5  ;;  %v3434_v14 = vor.u32 %v3701_v10, %v3433_v37  ;;  %v3210_v36 = vor.u32 %v3645_v25, %v3209_v23  ;;  %v3155_v58 = vld [vmem:[%s5474_s14 + $0x144] sm:$0xf0]  ;;  %v3663_v37 = vld [vmem:[%s5474_s14 + $0x244] sm:$0xf]  ;;  %v3610_v25 = vld [vmem:[%s5474_s14 + $0x98] sm:$0xf0] }
 0x2d0   :  { %v3158_v5 = vor.u32 %v3628_v57, %v3155_v58  ;;  %v3015_v57 = vld [vmem:[%s5474_s14 + $0x2c] sm:$0xf0]  ;;  %v3217_v58 = vld [vmem:[%s5474_s14 + $0x1a0] sm:$0xf] }
 0x2d2   :  { %2216 = vmatpush.bf16.msrb.mxu0 %v3346_v4  ;;  %2202 = vmatpush.bf16.msra.mxu3 %v3122_v21  ;;  %v3407_v21 = vld [vmem:[%s5474_s14 + $0x33c] sm:$0xf0] }
 0x2d3   :  { %2192 = vmatpush.bf16.msra.mxu2 %v3230_v51  ;;  %2178 = vmatpush.bf16.msra.mxu1 %v3006_v2  ;;  %v3410_v29 = vor.u32 %v3691_v20, %v3407_v21  ;;  %v3351_v51 = vld [vmem:[%s5474_s14 + $0x2cc] sm:$0xf0]  ;;  %v3323_v2 = vld [vmem:[%s5474_s14 + $0x294] sm:$0xf0]  ;;  %v3656_v20 = vld [vmem:[%s5474_s14 + $0x20c] sm:$0xf] }
 0x2d4   :  { %v3354_v61 = vor.u32 %v3677_v50, %v3351_v51  ;;  %v3267_v21 = vld [vmem:[%s5474_s14 + $0x224] sm:$0xf0]  ;;  %v3046_v50 = vor.u32 %v3600_v42, %v3043_v43 }
 0x2d5   :  { %v3413_v51 = vld [vmem:[%s5474_s14 + $0x328] sm:$0xf] }
 0x2d6   :  { %2217 = vmatpush.bf16.msrb.mxu0 %v3318_v15  ;;  %2203 = vmatpush.bf16.msra.mxu3 %v3094_v33  ;;  %v3438_v15 = vor.u32 %v3698_v11, %v3435_v60  ;;  %v3097_v60 = vld [vmem:[%s5474_s14 + $0xb8] sm:$0xf] }
 0x2da   :  { %2218 = vmatpush.bf16.msrb.mxu0 %v3290_v27  ;;  %2204 = vmatpush.bf16.msra.mxu3 %v3066_v47  ;;  %v3211_v27 = vld [vmem:[%s5474_s14 + $0x1b4] sm:$0xf0]  ;;  %v3349_v47 = vld [vmem:[%s5474_s14 + $0x2b0] sm:$0xf] }
 0x2db   :  { %v3214_v38 = vor.u32 %v3642_v26, %v3211_v27  ;;  %v3350_v59 = vor.u32 %v3680_v49, %v3349_v47  ;;  %v3607_v26 = vld [vmem:[%s5474_s14 + $0x84] sm:$0xf]  ;;  %v3071_v27 = vld [vmem:[%s5474_s14 + $0x9c] sm:$0xf0]  ;;  %v3042_v49 = vor.u32 %v3603_v41, %v3041_v39 }
 0x2dc   :  { %v3074_v35 = vor.u32 %v3607_v26, %v3071_v27  ;;  %v3245_v26 = vld [vmem:[%s5474_s14 + $0x1d8] sm:$0xf]  ;;  %v3653_v27 = vld [vmem:[%s5474_s14 + $0x1f0] sm:$0xf0] }
 0x2de   :  { %2219 = vmatpush.bf16.msrb.mxu0 %v3262_v40  ;;  %2205 = vmatpush.bf16.msra.mxu3 %v3038_v62  ;;  %v3321_v62 = vld [vmem:[%s5474_s14 + $0x278] sm:$0xf] }
 0x2e2   :  { %2220 = vmatpush.bf16.msrb.mxu0 %v3234_v55  ;;  %2206 = vmatpush.bf16.msra.mxu3 %v3010_v6  ;;  %v3153_v55 = vld [vmem:[%s5474_s14 + $0x128] sm:$0xf]  ;;  %v3125_v6 = vld [vmem:[%s5474_s14 + $0xf0] sm:$0xf] }
 0x2e3   :  { %v3154_v3 = vor.u32 %v3631_v56, %v3153_v55  ;;  %v3126_v10 = vor.u32 %v3624_v7, %v3125_v6  ;;  %v3596_v55 = vld [vmem:[%s5474_s14 + $0x28] sm:$0xf0]  ;;  %v3593_v56 = vld [vmem:[%s5474_s14 + $0x14] sm:$0xf]  ;;  %v3639_v6 = vld [vmem:[%s5474_s14 + $0x180] sm:$0xf0] }
 0x342   :  { %v1384_v8 = vpop.f32.mrf.mxu0 }
 0x343   :  { %v1385_v54 = vadd.f32 %v1384_v8, %v1278_v9  ;;  %v3621_v8 = vld [vmem:[%s5474_s14 + $0xf4] sm:$0xf] }
 0x345   :  { %v1390_v12 = vmax.f32 %v1385_v54, 0.0  ;;  %v3326_v54 = vor.u32 %v3670_v1, %v3323_v2  ;;  %v3385_v1 = vld [vmem:[%s5474_s14 + $0x2f0] sm:$0xf]  ;;  %v3688_v2 = vld [vmem:[%s5474_s14 + $0x308] sm:$0xf0] }
 0x346   :  { %v3386_v7 = vor.u32 %v3688_v2, %v3385_v1 }
 0x348   :  { %v1370_v4 = vpop.f32.mrf.mxu3 }
 0x349   :  { %v1371_v17 = vadd.f32 %v1370_v4, %v1277_v63  ;;  %v3322_v4 = vor.u32 %v3673_v0, %v3321_v62  ;;  %v3018_v0 = vor.u32 %v3593_v56, %v3015_v57 }
 0x34a   :  { %v1386_v48 = vpop.f32.mrf.mxu0 }
 0x34b   :  { %v1387_v44 = vadd.f32 %v1386_v48, %v1278_v9  ;;  %v1389_v32 = vmax.f32 %v1371_v17, 0.0  ;;  %v3127_v9 = vld [vmem:[%s5474_s14 + $0x10c] sm:$0xf0]  ;;  %v3666_v48 = vld [vmem:[%s5474_s14 + $0x258] sm:$0xf0] }
 0x34c   :  { %v3130_v11 = vor.u32 %v3621_v8, %v3127_v9  ;;  %v3265_v17 = vld [vmem:[%s5474_s14 + $0x208] sm:$0xf]  ;;  %v3357_v8 = vld [vmem:[%s5474_s14 + $0x2b8] sm:$0xf]  ;;  %v3681_v9 = vld [vmem:[%s5474_s14 + $0x2d0] sm:$0xf0] }
 0x34d   :  { %v1392_v13 = vmax.f32 %v1387_v44, 0.0  ;;  %v3295_v44 = vld [vmem:[%s5474_s14 + $0x25c] sm:$0xf0] }
 0x34e   :  { %v3298_v16 = vor.u32 %v3663_v37, %v3295_v44  ;;  %v3329_v37 = vld [vmem:[%s5474_s14 + $0x280] sm:$0xf]  ;;  %v3674_v44 = vld [vmem:[%s5474_s14 + $0x298] sm:$0xf0] }
 0x34f   :  { %v5132_v18 = vpack.c.bf16 %v1392_v13, %v1390_v12  ;;  %v3617_v12 = vld [vmem:[%s5474_s14 + $0xd0] sm:$0xf0]  ;;  %v3614_v13 = vld [vmem:[%s5474_s14 + $0xbc] sm:$0xf] }
 0x350   :  { %v1372_v22 = vpop.f32.mrf.mxu3 }
 0x351   :  { %v1373_v24 = vadd.f32 %v1372_v22, %v1277_v63  ;;  %2137 = vmatmul.bf16.vlgmr.msrb.gmra.mxu2 %v5132_v18  ;;  %2165 = vmatmul.bf16.vlgmr.msra.gmra.mxu0 %v5132_v18  ;;  %v3293_v63 = vld [vmem:[%s5474_s14 + $0x240] sm:$0xf]  ;;  %v3098_v22 = vor.u32 %v3617_v12, %v3097_v60  ;;  %v3625_v60 = vld [vmem:[%s5474_s14 + $0x110] sm:$0xf0]  ;;  %v3330_v12 = vor.u32 %v3674_v44, %v3329_v37 }
 0x352   :  { %2241 = vmatpush.bf16.msrb.mxu2 %v3434_v14  ;;  %2269 = vmatpush.bf16.msra.mxu0 %v3438_v15  ;;  %v3099_v14 = vld [vmem:[%s5474_s14 + $0xd4] sm:$0xf0]  ;;  %v3294_v15 = vor.u32 %v3666_v48, %v3293_v63  ;;  %v3632_v63 = vld [vmem:[%s5474_s14 + $0x148] sm:$0xf0]  ;;  %v3358_v48 = vor.u32 %v3681_v9, %v3357_v8 }
 0x353   :  { %v1391_v33 = vmax.f32 %v1373_v24, 0.0  ;;  %v3102_v23 = vor.u32 %v3614_v13, %v3099_v14  ;;  %v3069_v24 = vld [vmem:[%s5474_s14 + $0x80] sm:$0xf]  ;;  %v3301_v13 = vld [vmem:[%s5474_s14 + $0x248] sm:$0xf] }
 0x354   :  { %v3070_v34 = vor.u32 %v3610_v25, %v3069_v24  ;;  %v3667_v14 = vld [vmem:[%s5474_s14 + $0x260] sm:$0xf0] }
 0x355   :  { %v5172_v40 = vpack.c.bf16 %v1391_v33, %v1389_v32  ;;  %v3649_v32 = vld [vmem:[%s5474_s14 + $0x1d4] sm:$0xf]  ;;  %v3239_v33 = vld [vmem:[%s5474_s14 + $0x1ec] sm:$0xf0]  ;;  %v3611_v24 = vld [vmem:[%s5474_s14 + $0xa0] sm:$0xf0] }
 0x356   :  { %2242 = vmatpush.bf16.msrb.mxu2 %v3406_v28  ;;  %2270 = vmatpush.bf16.msra.mxu0 %v3410_v29  ;;  %v3266_v28 = vor.u32 %v3659_v19, %v3265_v17  ;;  %v3270_v29 = vor.u32 %v3656_v20, %v3267_v21  ;;  %v3618_v17 = vld [vmem:[%s5474_s14 + $0xd8] sm:$0xf0]  ;;  %v3302_v19 = vor.u32 %v3667_v14, %v3301_v13  ;;  %v3273_v20 = vld [vmem:[%s5474_s14 + $0x210] sm:$0xf]  ;;  %v3660_v21 = vld [vmem:[%s5474_s14 + $0x228] sm:$0xf0] }
 0x357   :  { %2123 = vmatmul.bf16.vlgmr.msrb.gmra.mxu1 %v5172_v40  ;;  %2151 = vmatmul.bf16.vlgmr.msrb.gmra.mxu3 %v5172_v40  ;;  %v3274_v25 = vor.u32 %v3660_v21, %v3273_v20 }
 0x358   :  { %2227 = vmatpush.bf16.msrb.mxu1 %v3210_v36  ;;  %2255 = vmatpush.bf16.msrb.mxu3 %v3214_v38  ;;  %v3441_v36 = vld [vmem:[%s5474_s14 + $0x360] sm:$0xf]  ;;  %v3702_v38 = vld [vmem:[%s5474_s14 + $0x378] sm:$0xf0] }
 0x359   :  { %v3442_v47 = vor.u32 %v3702_v38, %v3441_v36  ;;  %v5426_v36 = vld [vmem:[%s5476_s15] sm:$0x7f] }
 0x35a   :  { %2243 = vmatpush.bf16.msrb.mxu2 %v3378_v45  ;;  %2271 = vmatpush.bf16.msra.mxu0 %v3382_v46  ;;  %v3238_v45 = vor.u32 %v3652_v31, %v3237_v30  ;;  %v3242_v46 = vor.u32 %v3649_v32, %v3239_v33  ;;  %v3604_v30 = vld [vmem:[%s5474_s14 + $0x68] sm:$0xf0]  ;;  %v3246_v31 = vor.u32 %v3653_v27, %v3245_v26  ;;  %v3021_v33 = vld [vmem:[%s5474_s14 + $0x18] sm:$0xf]  ;;  %v1525_v38 = vperm.slane %v5426_v36, 0 }
 0x35c   :  { %2228 = vmatpush.bf16.msrb.mxu1 %v3182_v52  ;;  %2256 = vmatpush.bf16.msrb.mxu3 %v3186_v53  ;;  %v3695_v52 = vld [vmem:[%s5474_s14 + $0x340] sm:$0xf0]  ;;  %v3013_v53 = vld [vmem:[%s5474_s14 + $0x10] sm:$0xf] }
 0x35d   :  { %v3014_v62 = vor.u32 %v3596_v55, %v3013_v53 }
 0x35e   :  { %2244 = vmatpush.bf16.msrb.mxu2 %v3350_v59  ;;  %2272 = vmatpush.bf16.msra.mxu0 %v3354_v61  ;;  %v3646_v59 = vld [vmem:[%s5474_s14 + $0x1b8] sm:$0xf0]  ;;  %v3414_v61 = vor.u32 %v3695_v52, %v3413_v51 }
 0x360   :  { %2229 = vmatpush.bf16.msrb.mxu1 %v3154_v3  ;;  %2257 = vmatpush.bf16.msrb.mxu3 %v3158_v5  ;;  %v3218_v3 = vor.u32 %v3646_v59, %v3217_v58  ;;  %v3189_v5 = vld [vmem:[%s5474_s14 + $0x168] sm:$0xf]  ;;  %v1527_v58 = vperm.slane %v5426_v36, 2 }
 0x361   :  { %2193 = vmatmul.bf16.vlgmr.msra.gmra.mxu2 %v5132_v18  ;;  %2221 = vmatmul.bf16.vlgmr.msrb.gmra.mxu0 %v5132_v18 }
 0x362   :  { %2245 = vmatpush.bf16.msrb.mxu2 %v3322_v4  ;;  %2273 = vmatpush.bf16.msra.mxu0 %v3326_v54  ;;  %v3190_v4 = vor.u32 %v3639_v6, %v3189_v5  ;;  %v3161_v54 = vld [vmem:[%s5474_s14 + $0x130] sm:$0xf] }
 0x364   :  { %2230 = vmatpush.bf16.msrb.mxu1 %v3126_v10  ;;  %2258 = vmatpush.bf16.msrb.mxu3 %v3130_v11  ;;  %v3162_v10 = vor.u32 %v3632_v63, %v3161_v54  ;;  %v3133_v11 = vld [vmem:[%s5474_s14 + $0xf8] sm:$0xf] }
 0x366   :  { %2246 = vmatpush.bf16.msrb.mxu2 %v3294_v15  ;;  %2274 = vmatpush.bf16.msra.mxu0 %v3298_v16  ;;  %v3134_v15 = vor.u32 %v3625_v60, %v3133_v11  ;;  %v3105_v16 = vld [vmem:[%s5474_s14 + $0xc0] sm:$0xf] }
 0x367   :  { %2179 = vmatmul.bf16.vlgmr.msra.gmra.mxu1 %v5172_v40  ;;  %2207 = vmatmul.bf16.vlgmr.msra.gmra.mxu3 %v5172_v40 }
 0x368   :  { %2231 = vmatpush.bf16.msrb.mxu1 %v3098_v22  ;;  %2259 = vmatpush.bf16.msrb.mxu3 %v3102_v23  ;;  %v3106_v22 = vor.u32 %v3618_v17, %v3105_v16  ;;  %v3077_v23 = vld [vmem:[%s5474_s14 + $0x88] sm:$0xf] }
 0x36a   :  { %2247 = vmatpush.bf16.msrb.mxu2 %v3266_v28  ;;  %2275 = vmatpush.bf16.msra.mxu0 %v3270_v29  ;;  %v3078_v28 = vor.u32 %v3611_v24, %v3077_v23  ;;  %v3049_v29 = vld [vmem:[%s5474_s14 + $0x50] sm:$0xf]  ;;  %v1529_v24 = vperm.slane %v5426_v36, 4 }
 0x36b   :  { %v3050_v32 = vor.u32 %v3604_v30, %v3049_v29 }
 0x36c   :  { %2232 = vmatpush.bf16.msrb.mxu1 %v3070_v34  ;;  %2260 = vmatpush.bf16.msrb.mxu3 %v3074_v35  ;;  %v3597_v34 = vld [vmem:[%s5474_s14 + $0x30] sm:$0xf0] }
 0x36d   :  { %v3022_v35 = vor.u32 %v3597_v34, %v3021_v33 }
 0x36e   :  { %2248 = vmatpush.bf16.msrb.mxu2 %v3238_v45  ;;  %2276 = vmatpush.bf16.msra.mxu0 %v3242_v46  ;;  %v1526_v46 = vperm.slane %v5426_v36, 1 }
 0x370   :  { %2233 = vmatpush.bf16.msrb.mxu1 %v3042_v49  ;;  %2261 = vmatpush.bf16.msrb.mxu3 %v3046_v50 }
 0x371   :  { %2249 = vmatmul.bf16.vlgmr.msrb.gmra.mxu2 %v5132_v18  ;;  %2277 = vmatmul.bf16.vlgmr.msra.gmra.mxu0 %v5132_v18 }
 0x372   :  { %2297 = vmatpush.bf16.msra.mxu2 %v3442_v47 }
 0x374   :  { %2234 = vmatpush.bf16.msrb.mxu1 %v3014_v62  ;;  %2262 = vmatpush.bf16.msrb.mxu3 %v3018_v0 }
 0x376   :  { %2298 = vmatpush.bf16.msra.mxu2 %v3414_v61 }
 0x377   :  { %2235 = vmatmul.bf16.vlgmr.msrb.gmra.mxu1 %v5172_v40  ;;  %2263 = vmatmul.bf16.vlgmr.msrb.gmra.mxu3 %v5172_v40 }
 0x378   :  { %2283 = vmatpush.bf16.msra.mxu1 %v3218_v3 }
 0x37a   :  { %2299 = vmatpush.bf16.msra.mxu2 %v3386_v7 }
 0x37c   :  { %2284 = vmatpush.bf16.msra.mxu1 %v3190_v4  ;;  %v1528_v4 = vperm.slane %v5426_v36, 3 }
 0x37e   :  { %2300 = vmatpush.bf16.msra.mxu2 %v3358_v48 }
 0x380   :  { %2285 = vmatpush.bf16.msra.mxu1 %v3162_v10 }
 0x382   :  { %2301 = vmatpush.bf16.msra.mxu2 %v3330_v12 }
 0x384   :  { %2286 = vmatpush.bf16.msra.mxu1 %v3134_v15 }
 0x386   :  { %2302 = vmatpush.bf16.msra.mxu2 %v3302_v19 }
 0x388   :  { %2287 = vmatpush.bf16.msra.mxu1 %v3106_v22 }
 0x38a   :  { %2303 = vmatpush.bf16.msra.mxu2 %v3274_v25 }
 0x38c   :  { %2288 = vmatpush.bf16.msra.mxu1 %v3078_v28 }
 0x38e   :  { %2304 = vmatpush.bf16.msra.mxu2 %v3246_v31 }
 0x390   :  { %2289 = vmatpush.bf16.msra.mxu1 %v3050_v32 }
 0x391   :  { %2305 = vmatmul.bf16.vlgmr.msra.gmra.mxu2 %v5132_v18 }
 0x394   :  { %2290 = vmatpush.bf16.msra.mxu1 %v3022_v35 }
 0x397   :  { %2291 = vmatmul.bf16.vlgmr.msra.gmra.mxu1 %v5172_v40 }
 0x3ce   :  { %v2166_v39 = vpop.f32.mrf.mxu0 }
 0x3d4   :  { %v2124_v41 = vpop.f32.mrf.mxu1  ;;  %v2138_v42 = vpop.f32.mrf.mxu2 }
 0x3d5   :  { %v2125_v43 = vadd.f32 %v2124_v41, %v1525_v38 }
 0x3d6   :  { %v2168_v40 = vpop.f32.mrf.mxu0 }
 0x3d7   :  { %v2139_v45 = vadd.f32 %v2138_v42, %v2125_v43  ;;  %v1530_v43 = vperm.slane %v5426_v36, 5 }
 0x3d9   :  { %v2311_v47 = vmul.f32 0.5, %v2139_v45 }
 0x3da   :  { %v2152_v49 = vpop.f32.mrf.mxu3 }
 0x3db   :  { %v2153_v18 = vadd.f32 %v2152_v49, %v1526_v46  ;;  %3711 = vtanh.f32 %v2311_v47 }
 0x3dc   :  { %v2126_v50 = vpop.f32.mrf.mxu1  ;;  %v2140_v51 = vpop.f32.mrf.mxu2 }
 0x3dd   :  { %v2167_v52 = vadd.f32 %v2166_v39, %v2153_v18  ;;  %v2127_v53 = vadd.f32 %v2126_v50, %v1525_v38 }
 0x3de   :  { %v2222_v7 = vpop.f32.mrf.mxu0 }
 0x3df   :  { %v2312_v55 = vmul.f32 0.5, %v2167_v52  ;;  %v2141_v56 = vadd.f32 %v2140_v51, %v2127_v53 }
 0x3e1   :  { %3713 = vtanh.f32 %v2312_v55  ;;  %v2318_v57 = vmul.f32 0.5, %v2141_v56  ;;  %v3712_v61 = vpop.eup %3711 }
 0x3e2   :  { %v2154_v59 = vpop.f32.mrf.mxu3  ;;  %v2339_v5 = vmul.f32 0.5, %v3712_v61 }
 0x3e3   :  { %v2155_v62 = vadd.f32 %v2154_v59, %v1526_v46  ;;  %3715 = vtanh.f32 %v2318_v57 }
 0x3e4   :  { %v2180_v0 = vpop.f32.mrf.mxu1  ;;  %v2194_v1 = vpop.f32.mrf.mxu2  ;;  %v2353_v48 = vadd.f32 0.5, %v2339_v5 }
 0x3e5   :  { %v2169_v2 = vadd.f32 %v2168_v40, %v2155_v62  ;;  %v2181_v3 = vadd.f32 %v2180_v0, %v1527_v58 }
 0x3e6   :  { %v2224_v22 = vpop.f32.mrf.mxu0 }
 0x3e7   :  { %v3714_v6 = vpop.eup %3713  ;;  %v2319_v8 = vmul.f32 0.5, %v2169_v2  ;;  %v2195_v9 = vadd.f32 %v2194_v1, %v2181_v3 }
 0x3e8   :  { %v2340_v54 = vmul.f32 0.5, %v3714_v6 }
 0x3e9   :  { %3717 = vtanh.f32 %v2319_v8  ;;  %v2313_v63 = vmul.f32 0.5, %v2195_v9  ;;  %v3716_v10 = vpop.eup %3715 }
 0x3ea   :  { %v2354_v37 = vadd.f32 0.5, %v2340_v54  ;;  %v2208_v44 = vpop.f32.mrf.mxu3  ;;  %v2346_v16 = vmul.f32 0.5, %v3716_v10 }
 0x3eb   :  { %v2209_v11 = vadd.f32 %v2208_v44, %v1528_v4  ;;  %3719 = vtanh.f32 %v2313_v63 }
 0x3ec   :  { %v2367_v60 = vpack.c.bf16 %v2354_v37, %v2353_v48  ;;  %v2182_v12 = vpop.f32.mrf.mxu1  ;;  %v2196_v13 = vpop.f32.mrf.mxu2  ;;  %v2360_v25 = vadd.f32 0.5, %v2346_v16 }
 0x3ed   :  { %v2223_v14 = vadd.f32 %v2222_v7, %v2209_v11  ;;  %v2183_v15 = vadd.f32 %v2182_v12, %v1527_v58 }
 0x3ee   :  { %2375 = vst [vmem:[%s5477_s16] sm:$0xff] %v2367_v60  ;;  %v2278_v18 = vpop.f32.mrf.mxu0  ;;  %v1531_v60 = vperm.slane %v5426_v36, 6 }
 0x3ef   :  { %v3718_v17 = vpop.eup %3717  ;;  %v2314_v19 = vmul.f32 0.5, %v2223_v14  ;;  %v2197_v20 = vadd.f32 %v2196_v13, %v2183_v15 }
 0x3f0   :  { %v2347_v21 = vmul.f32 0.5, %v3718_v17 }
 0x3f1   :  { %3721 = vtanh.f32 %v2314_v19  ;;  %v2320_v23 = vmul.f32 0.5, %v2197_v20  ;;  %v3720_v28 = vpop.eup %3719 }
 0x3f2   :  { %v2361_v26 = vadd.f32 0.5, %v2347_v21  ;;  %v2210_v27 = vpop.f32.mrf.mxu3  ;;  %v2341_v35 = vmul.f32 0.5, %v3720_v28 }
 0x3f3   :  { %v2211_v29 = vadd.f32 %v2210_v27, %v1528_v4  ;;  %3723 = vtanh.f32 %v2320_v23 }
 0x3f4   :  { %v2371_v30 = vpack.c.bf16 %v2361_v26, %v2360_v25  ;;  %v2236_v31 = vpop.f32.mrf.mxu1  ;;  %v2250_v32 = vpop.f32.mrf.mxu2  ;;  %v2355_v45 = vadd.f32 0.5, %v2341_v35 }
 0x3f5   :  { %v2225_v33 = vadd.f32 %v2224_v22, %v2211_v29  ;;  %v2237_v34 = vadd.f32 %v2236_v31, %v1529_v24 }
 0x3f6   :  { %2380 = vst [vmem:[%s5477_s16 + $0x1c] sm:$0xff] %v2371_v30  ;;  %v2280_v8 = vpop.f32.mrf.mxu0 }
 0x3f7   :  { %v3722_v38 = vpop.eup %3721  ;;  %v2321_v39 = vmul.f32 0.5, %v2225_v33  ;;  %v2251_v41 = vadd.f32 %v2250_v32, %v2237_v34 }
 0x3f8   :  { %v2342_v42 = vmul.f32 0.5, %v3722_v38 }
 0x3f9   :  { %3725 = vtanh.f32 %v2321_v39  ;;  %v2315_v47 = vmul.f32 0.5, %v2251_v41  ;;  %v3724_v49 = vpop.eup %3723 }
 0x3fa   :  { %v2356_v46 = vadd.f32 0.5, %v2342_v42  ;;  %v2264_v50 = vpop.f32.mrf.mxu3  ;;  %v2348_v55 = vmul.f32 0.5, %v3724_v49 }
 0x3fb   :  { %v2265_v40 = vadd.f32 %v2264_v50, %v1530_v43  ;;  %3727 = vtanh.f32 %v2315_v47 }
 0x3fc   :  { %v2368_v51 = vpack.c.bf16 %v2356_v46, %v2355_v45  ;;  %v2238_v52 = vpop.f32.mrf.mxu1  ;;  %v2252_v57 = vpop.f32.mrf.mxu2  ;;  %v2362_v0 = vadd.f32 0.5, %v2348_v55 }
 0x3fd   :  { %v2239_v53 = vadd.f32 %v2238_v52, %v1529_v24  ;;  %v2279_v56 = vadd.f32 %v2278_v18, %v2265_v40 }
 0x3fe   :  { %2376 = vst [vmem:[%s5477_s16 + $0x8] sm:$0xff] %v2368_v51 }
 0x3ff   :  { %v3726_v58 = vpop.eup %3725  ;;  %v2253_v59 = vadd.f32 %v2252_v57, %v2239_v53  ;;  %v2316_v62 = vmul.f32 0.5, %v2279_v56 }
 0x400   :  { %v2349_v61 = vmul.f32 0.5, %v3726_v58 }
 0x401   :  { %3729 = vtanh.f32 %v2316_v62  ;;  %v2322_v2 = vmul.f32 0.5, %v2253_v59  ;;  %v3728_v5 = vpop.eup %3727 }
 0x402   :  { %v2363_v1 = vadd.f32 0.5, %v2349_v61  ;;  %v2266_v3 = vpop.f32.mrf.mxu3  ;;  %v2343_v4 = vmul.f32 0.5, %v3728_v5 }
 0x403   :  { %v2267_v7 = vadd.f32 %v2266_v3, %v1530_v43  ;;  %3731 = vtanh.f32 %v2322_v2 }
 0x404   :  { %v2372_v6 = vpack.c.bf16 %v2363_v1, %v2362_v0  ;;  %v2357_v37 = vadd.f32 0.5, %v2343_v4 }
 0x405   :  { %v2281_v9 = vadd.f32 %v2280_v8, %v2267_v7 }
 0x406   :  { %2381 = vst [vmem:[%s5477_s16 + $0x24] sm:$0xff] %v2372_v6 }
 0x407   :  { %v3730_v54 = vpop.eup %3729  ;;  %v2323_v63 = vmul.f32 0.5, %v2281_v9 }
 0x408   :  { %v2344_v48 = vmul.f32 0.5, %v3730_v54 }
 0x409   :  { %3733 = vtanh.f32 %v2323_v63  ;;  %v3732_v10 = vpop.eup %3731 }
 0x40a   :  { %v2358_v44 = vadd.f32 0.5, %v2344_v48  ;;  %v2350_v12 = vmul.f32 0.5, %v3732_v10 }
 0x40c   :  { %v2369_v11 = vpack.c.bf16 %v2358_v44, %v2357_v37  ;;  %v2364_v19 = vadd.f32 0.5, %v2350_v12 }
 0x40e   :  { %2377 = vst [vmem:[%s5477_s16 + $0x10] sm:$0xff] %v2369_v11 }
 0x40f   :  { %v3734_v13 = vpop.eup %3733 }
 0x410   :  { %v2351_v14 = vmul.f32 0.5, %v3734_v13 }
 0x412   :  { %v2365_v20 = vadd.f32 0.5, %v2351_v14 }
 0x414   :  { %v2292_v15 = vpop.f32.mrf.mxu1  ;;  %v2306_v16 = vpop.f32.mrf.mxu2  ;;  %v2373_v22 = vpack.c.bf16 %v2365_v20, %v2364_v19 }
 0x415   :  { %v2293_v17 = vadd.f32 %v2292_v15, %v1531_v60 }
 0x416   :  { %2382 = vst [vmem:[%s5477_s16 + $0x2c] sm:$0xff] %v2373_v22 }
 0x417   :  { %v2307_v21 = vadd.f32 %v2306_v16, %v2293_v17 }
 0x419   :  { %v2317_v23 = vmul.f32 0.5, %v2307_v21 }
 0x41b   :  { %3735 = vtanh.f32 %v2317_v23 }
 0x41c   :  { %v2294_v36 = vpop.f32.mrf.mxu1  ;;  %v2308_v25 = vpop.f32.mrf.mxu2 }
 0x41d   :  { %v2295_v24 = vadd.f32 %v2294_v36, %v1531_v60 }
 0x41f   :  { %v2309_v26 = vadd.f32 %v2308_v25, %v2295_v24 }
 0x421   :  { %v3736_v27 = vpop.eup %3735  ;;  %v2324_v28 = vmul.f32 0.5, %v2309_v26 }
 0x422   :  { %v2345_v29 = vmul.f32 0.5, %v3736_v27 }
 0x423   :  { %3737 = vtanh.f32 %v2324_v28 }
 0x424   :  { %v2359_v30 = vadd.f32 0.5, %v2345_v29 }
 0x426   :  { %v2370_v31 = vpack.c.bf16 %v2359_v30, %v2359_v30 }
 0x428   :  { %2379 = vst.msk [vmem:[%s5477_s16 + $0x18] sm:$0xf] %vm2378_vm2, %v2370_v31 }
 0x429   :  { %v3738_v32 = vpop.eup %3737 }
 0x42a   :  { %v2352_v33 = vmul.f32 0.5, %v3738_v32 }
 0x42c   :  { %v2366_v34 = vadd.f32 0.5, %v2352_v33 }
 0x42e   :  { %v2374_v35 = vpack.c.bf16 %v2366_v34, %v2366_v34 }
 0x430   :  { %2383 = vst.msk [vmem:[%s5477_s16 + $0x34] sm:$0xf] %vm2378_vm2, %v2374_v35 }

</bundles_post_ra>
